<compile_context>
chip_gen: v7x
topology: tpu7x:2x2x1
jax: 0.10.0
libtpu: 0.0.40
codegen_flags: <defaults>
</compile_context>

<pallas_src>
import math
from functools import partial

import jax
import jax.numpy as jnp
from jax import lax
from jax.experimental import pallas as pl
from jax.experimental.pallas import tpu as pltpu


def _ipow(x, p):
    """x**p. Integer-valued exponents via multiply chain (safe Mosaic lowering)."""
    pf = float(p)
    if pf.is_integer() and pf >= 0:
        n = int(pf)
        if n == 0:
            return jnp.ones_like(x)
        result = None
        base = x
        while n > 0:
            if n & 1:
                result = base if result is None else result * base
            n >>= 1
            if n:
                base = base * base
        return result
    return jnp.power(x, p)


def _round_up(x, m):
    return ((x + m - 1) // m) * m


# -----------------------------------------------------------------------------
# Kernel 1 (grid=(bs, na_tiles), both axes "parallel"): per anchor-tile
#   - select_candidates_in_gts (anchor-in-gt mask, used only to gate outputs)
#   - class-score gather via one-hot NT matmul on the MXU (bf16 in, f32 acc)
#   - CIoU overlaps (atan terms precomputed outside; no guaranteed Mosaic atan lowering)
#   - align_metric = scores^alpha * overlaps^beta
#   - per-tile top-k (iterative lane max/argmax extraction on the XLU)
# -----------------------------------------------------------------------------
def _metrics_kernel(pd_scores_ref, pd_pack_ref, gt_pack_ref,
                    align_ref, overlaps_ref, tkv_ref, tki_ref,
                    *, alpha, beta, eps, iou_eps, topk, tile_na, na_real, pad_lanes):
    pds = pd_scores_ref[0]        # (tile_na, nc)  native layout (bf16 or f32)
    pdp = pd_pack_ref[0]          # (8, tile_na): x1,y1,x2,y2,atan(w/h),acx,acy,pad
    gtp = gt_pack_ref[0]          # (nm, 8): x1,y1,x2,y2,label,mask_gt,atan(w/h),pad

    nm = gtp.shape[0]
    nc = pds.shape[1]

    b1_x1 = gtp[:, 0:1]; b1_y1 = gtp[:, 1:2]; b1_x2 = gtp[:, 2:3]; b1_y2 = gtp[:, 3:4]
    labels = gtp[:, 4:5].astype(jnp.int32)
    maskgt = gtp[:, 5:6]
    gatan = gtp[:, 6:7]

    b2_x1 = pdp[0:1, :]; b2_y1 = pdp[1:2, :]; b2_x2 = pdp[2:3, :]; b2_y2 = pdp[3:4, :]
    patan = pdp[4:5, :]
    acx = pdp[5:6, :]; acy = pdp[6:7, :]

    # ---- select_candidates_in_gts (padded anchors carry a -1e9 sentinel -> never inside) ----
    d_min = jnp.minimum(jnp.minimum(acx - b1_x1, acy - b1_y1),
                        jnp.minimum(b1_x2 - acx, b1_y2 - acy))            # (nm, tile_na)
    mask_b = jnp.logical_and(d_min > eps, maskgt > 0.0)

    # ---- class score gather: one-hot(nm, nc) x pd_scores(tile, nc)^T (NT contraction) ----
    iota_c = lax.broadcasted_iota(jnp.int32, (nm, nc), 1)
    onehot = (iota_c == labels).astype(pds.dtype)                          # (nm, nc)
    bbox_scores = lax.dot_general(onehot, pds, (((1,), (1,)), ((), ())),
                                  preferred_element_type=jnp.float32)      # (nm, tile_na)
    bbox_scores = jnp.where(mask_b, bbox_scores, 0.0)

    # ---- CIoU ----
    w1 = b1_x2 - b1_x1
    h1 = b1_y2 - b1_y1 + iou_eps
    w2 = b2_x2 - b2_x1
    h2 = b2_y2 - b2_y1 + iou_eps
    inter = (jnp.maximum(jnp.minimum(b1_x2, b2_x2) - jnp.maximum(b1_x1, b2_x1), 0.0) *
             jnp.maximum(jnp.minimum(b1_y2, b2_y2) - jnp.maximum(b1_y1, b2_y1), 0.0))
    union = w1 * h1 + w2 * h2 - inter + iou_eps
    iou = inter / union
    cw = jnp.maximum(b1_x2, b2_x2) - jnp.minimum(b1_x1, b2_x1)
    ch = jnp.maximum(b1_y2, b2_y2) - jnp.minimum(b1_y1, b2_y1)
    c2 = cw * cw + ch * ch + iou_eps
    rho2 = ((b2_x1 + b2_x2 - b1_x1 - b1_x2) ** 2 +
            (b2_y1 + b2_y2 - b1_y1 - b1_y2) ** 2) * 0.25
    v = (4.0 / (math.pi ** 2)) * (patan - gatan) ** 2                      # (nm, tile_na)
    alpha_ciou = v / (v - iou + (1.0 + iou_eps))
    ciou = iou - (rho2 / c2 + v * alpha_ciou)

    overlaps = jnp.where(mask_b, jnp.maximum(ciou, 0.0), 0.0)
    align = _ipow(bbox_scores, alpha) * _ipow(overlaps, beta)

    idx_row = (pl.program_id(1) * tile_na
               + lax.broadcasted_iota(jnp.int32, (1, tile_na), 1))         # (1, tile_na)
    if pad_lanes:
        # keep padded anchor lanes strictly below any real candidate for the top-k
        align = jnp.where(idx_row < na_real, align, -1.0)

    align_ref[0] = align
    overlaps_ref[0] = overlaps

    # ---- per-tile top-k: topk iterative max/argmax extractions on (nm, tile_na).
    #      Lane reductions run on the XLU, which is idle here (VPU/MXU do the metric work).
    idx_b = jnp.broadcast_to(idx_row, (nm, tile_na))
    iota_k = lax.broadcasted_iota(jnp.int32, (nm, topk), 1)
    work = align
    tkv = jnp.zeros((nm, topk), jnp.float32)
    tki = jnp.zeros((nm, topk), jnp.int32)
    big_idx = jnp.int32(2147483647)
    for k in range(topk):
        m = jnp.max(work, axis=1, keepdims=True)                           # (nm, 1)
        am = jnp.min(jnp.where(work == m, idx_b, big_idx),
                     axis=1, keepdims=True)                                # (nm, 1) global idx
        tkv = jnp.where(iota_k == k, m, tkv)
        tki = jnp.where(iota_k == k, am, tki)
        work = jnp.where(idx_b == am, -3.0e38, work)
    tkv_ref[0, 0] = tkv
    tki_ref[0, 0] = tki


# -----------------------------------------------------------------------------
# Kernel 2 (grid=(bs, na_tiles), both axes "parallel"): per anchor-tile
#   - rebuild mask_pos = (in top-k) * (in gt) * mask_gt on-chip (no HBM one-hot blow-up)
#   - select_highest_overlaps dedup -> target_gt_idx, fg_mask
#   - per-anchor selected align (am_sel); per-gt maxima emitted as per-tile partials
# -----------------------------------------------------------------------------
def _assign_kernel(align_ref, ov_ref, topk_idx_ref, gt_pack_ref, anc_t_ref,
                   tgt_ref, fg_ref, amsel_ref, pos_a_ref, pos_o_ref,
                   *, eps, topk, tile_na):
    t = pl.program_id(1)
    align = align_ref[0]          # (nm, tile_na)
    ov = ov_ref[0]                # (nm, tile_na)
    tki = topk_idx_ref[0]         # (nm, topk) int32 (global anchor indices)
    gtp = gt_pack_ref[0]          # (nm, 8)
    anc_t = anc_t_ref[...]        # (2, tile_na)

    nm = align.shape[0]

    b1_x1 = gtp[:, 0:1]; b1_y1 = gtp[:, 1:2]; b1_x2 = gtp[:, 2:3]; b1_y2 = gtp[:, 3:4]
    maskgt = gtp[:, 5:6]
    acx = anc_t[0:1, :]; acy = anc_t[1:2, :]

    # recompute the cheap in-gts test instead of round-tripping it through HBM
    d_min = jnp.minimum(jnp.minimum(acx - b1_x1, acy - b1_y1),
                        jnp.minimum(b1_x2 - acx, b1_y2 - acy))
    mask_in = (d_min > eps).astype(jnp.float32)                            # (nm, tile_na)

    # top-k membership: lax-style top-k indices are distinct per gt, so the reference's
    # "count > 1 -> 0" can only trigger for invalid gt rows, which mask_gt kills below.
    # TODO(synk): a threshold test (align >= kth value) would cut this to ~2 passes but
    # changes behaviour on ties at zero; keep the exact test as a balanced OR tree instead.
    idx = t * tile_na + lax.broadcasted_iota(jnp.int32, (nm, tile_na), 1)
    hits = [tki[:, k:k + 1] == idx for k in range(topk)]
    while len(hits) > 1:
        nxt = [jnp.logical_or(hits[i], hits[i + 1]) for i in range(0, len(hits) - 1, 2)]
        if len(hits) % 2:
            nxt.append(hits[-1])
        hits = nxt
    hit = hits[0].astype(jnp.float32)

    mp = hit * mask_in * maskgt                                            # mask_pos

    # select_highest_overlaps (branchless; identical when no multi-assignment)
    iota_g = lax.broadcasted_iota(jnp.int32, (nm, tile_na), 0)
    fg = jnp.sum(mp, axis=0, keepdims=True)                                # (1, tile_na)
    ov_max = jnp.max(ov, axis=0, keepdims=True)
    ov_argmax = jnp.min(jnp.where(ov == ov_max, iota_g, nm), axis=0, keepdims=True)
    is_max = (iota_g == ov_argmax).astype(jnp.float32)
    mp2 = jnp.where(fg > 1.0, is_max, mp)
    fg2 = jnp.sum(mp2, axis=0, keepdims=True)

    mp_max = jnp.max(mp2, axis=0, keepdims=True)
    tgt = jnp.min(jnp.where(mp2 == mp_max, iota_g, nm), axis=0, keepdims=True)

    am = align * mp2
    om = ov * mp2

    tgt_ref[0] = tgt
    fg_ref[0] = fg2
    amsel_ref[0] = jnp.sum(am, axis=0, keepdims=True)   # <=1 nonzero per anchor -> its value

    # per-gt maxima over anchors of this tile; cross-tile max happens in XLA glue,
    # so there is no resident-block RMW and the anchor axis stays fully parallel.
    pos_a_ref[0, 0] = jnp.max(am, axis=1, keepdims=True)                   # (nm, 1)
    pos_o_ref[0, 0] = jnp.max(om, axis=1, keepdims=True)                   # (nm, 1)


class TaskAlignedAssignerPallas:
    """JAX/Pallas port of ultralytics oriTaskAlignedAssigner.forward."""

    def __init__(self, topk=13, num_classes=80, alpha=1.0, beta=6.0, eps=1e-9,
                 tile_na=None, score_dtype=jnp.bfloat16):
        self.topk = topk
        self.num_classes = num_classes
        self.bg_idx = num_classes
        self.alpha = alpha
        self.beta = beta
        self.eps = eps
        self.tile_na = tile_na          # None -> auto (VMEM + padding-waste aware)
        self.score_dtype = score_dtype  # bf16 halves the dominant kernel-1 HBM stream

    # ---- generation-aware VMEM limit: ~48 MiB on v7x (64 MiB phys), 64 MiB on v5e/v6e ----
    def _vmem_limit(self):
        try:
            info = pltpu.get_tpu_info()
            phys = int(getattr(info, "vmem_capacity_bytes", 128 * 1024 * 1024))
        except Exception:
            phys = 128 * 1024 * 1024
        return min(64 * 1024 * 1024, (phys * 3) // 4)

    # ---- pick the anchor tile: fewest grid steps first, then least padding, VMEM capped ----
    def _pick_tile(self, na, nm, nc, vmem_limit):
        na128 = _round_up(na, 128)
        sbytes = 2 if self.score_dtype == jnp.bfloat16 else 4

        def step_bytes(tile):
            io1 = tile * (nc * sbytes + 8 * 4 + 2 * nm * 4)    # K1 in + out streams
            io2 = tile * (2 * nm * 4 + 2 * 4 + 3 * 4)          # K2 in + out streams
            tmp = 16 * nm * tile * 4                           # rough in-kernel live temporaries
            return max(2 * io1, 2 * io2) + tmp                 # 2x = double buffering

        budget = vmem_limit // 2
        max_tile = 128
        t = 256
        while t <= 4096:
            if step_bytes(t) <= budget:
                max_tile = t
            t += 128
        max_tile = min(max(max_tile, 128), na128)

        best_t, best_key = 128, None
        t = 128
        while t <= max_tile:
            na_pad = _round_up(na, t)
            key = (na_pad // t, na_pad)        # (grid steps, padded size)
            if best_key is None or key < best_key:
                best_key, best_t = key, t
            t += 128
        return best_t

    def __call__(self, pd_scores, pd_bboxes, anc_points, gt_labels, gt_bboxes, mask_gt):
        bs, na, nc = pd_scores.shape
        nm = gt_bboxes.shape[1]
        if nm == 0:
            return (jnp.full((bs, na), self.bg_idx, jnp.int32),
                    jnp.zeros_like(pd_bboxes),
                    jnp.zeros_like(pd_scores),
                    jnp.zeros((bs, na), dtype=bool),
                    jnp.zeros((bs, na), jnp.int32))

        iou_eps = 1e-7  # bbox_iou eps
        f32 = jnp.float32

        vmem_limit = self._vmem_limit()
        if self.tile_na is None:
            tile_na = self._pick_tile(na, nm, nc, vmem_limit)
        else:
            tile_na = min(_round_up(self.tile_na, 128), _round_up(na, 128))
        na_pad = _round_up(na, tile_na)
        n_tiles = na_pad // tile_na
        pad = na_pad - na

        pd_scores_q = pd_scores.astype(self.score_dtype)
        pd_bboxes_f = pd_bboxes.astype(f32)
        anc_f = anc_points.astype(f32)
        gt_labels_i = gt_labels.astype(jnp.int32)
        gt_bboxes_f = gt_bboxes.astype(f32)
        mask_gt_f = mask_gt.astype(f32)

        if pad:
            pd_scores_q = jnp.pad(pd_scores_q, ((0, 0), (0, pad), (0, 0)))
            pd_bboxes_f = jnp.pad(pd_bboxes_f, ((0, 0), (0, pad), (0, 0)))
            # padded anchors get a far-away sentinel -> never inside any gt box
            anc_f = jnp.pad(anc_f, ((0, pad), (0, 0)), constant_values=-1e9)

        anc_t = jnp.transpose(anc_f, (1, 0))                               # (2, na_pad)
        pd_bboxes_t = jnp.transpose(pd_bboxes_f, (0, 2, 1))                # (bs, 4, na_pad)

        # TODO(synk): arctan has no guaranteed Mosaic lowering; keep the tiny atan terms in XLA.
        gt_w = gt_bboxes_f[..., 2] - gt_bboxes_f[..., 0]
        gt_h = gt_bboxes_f[..., 3] - gt_bboxes_f[..., 1] + iou_eps
        gt_atan = jnp.arctan(gt_w / gt_h)[..., None]                       # (bs, nm, 1)
        pd_w = pd_bboxes_f[..., 2] - pd_bboxes_f[..., 0]
        pd_h = pd_bboxes_f[..., 3] - pd_bboxes_f[..., 1] + iou_eps
        pd_atan = jnp.arctan(pd_w / pd_h)[:, None, :]                      # (bs, 1, na_pad)

        # all per-anchor side data in one 8-sublane block (single aligned DMA per grid step)
        pd_pack = jnp.concatenate(
            [pd_bboxes_t, pd_atan,
             jnp.broadcast_to(anc_t[None], (bs, 2, na_pad)),
             jnp.zeros((bs, 1, na_pad), f32)], axis=1)                     # (bs, 8, na_pad)

        # pack per-gt scalars into one lane-packed block
        gt_pack = jnp.concatenate(
            [gt_bboxes_f, gt_labels_i.astype(f32), mask_gt_f, gt_atan,
             jnp.zeros((bs, nm, 1), f32)], axis=-1)                        # (bs, nm, 8)

        # ---- Kernel 1: align_metric / overlaps / per-tile top-k, tiled over anchors ----
        kern1 = partial(_metrics_kernel, alpha=self.alpha, beta=self.beta,
                        eps=self.eps, iou_eps=iou_eps, topk=self.topk,
                        tile_na=tile_na, na_real=na, pad_lanes=pad)
        align_metric, overlaps, tk_vals, tk_idxs = pl.pallas_call(
            kern1,
            grid=(bs, n_tiles),
            in_specs=[
                pl.BlockSpec((1, tile_na, nc), lambda b, t: (b, t, 0)),
                pl.BlockSpec((1, 8, tile_na), lambda b, t: (b, 0, t)),
                pl.BlockSpec((1, nm, 8), lambda b, t: (b, 0, 0)),
            ],
            out_specs=[
                pl.BlockSpec((1, nm, tile_na), lambda b, t: (b, 0, t)),
                pl.BlockSpec((1, nm, tile_na), lambda b, t: (b, 0, t)),
                pl.BlockSpec((1, 1, nm, self.topk), lambda b, t: (b, t, 0, 0)),
                pl.BlockSpec((1, 1, nm, self.topk), lambda b, t: (b, t, 0, 0)),
            ],
            out_shape=[
                jax.ShapeDtypeStruct((bs, nm, na_pad), f32),
                jax.ShapeDtypeStruct((bs, nm, na_pad), f32),
                jax.ShapeDtypeStruct((bs, n_tiles, nm, self.topk), f32),
                jax.ShapeDtypeStruct((bs, n_tiles, nm, self.topk), jnp.int32),
            ],
            compiler_params=pltpu.CompilerParams(
                dimension_semantics=("parallel", "parallel"),
                vmem_limit_bytes=vmem_limit),
        )(pd_scores_q, pd_pack, gt_pack)

        # ---- merge the tiny per-tile top-k lists (n_tiles*topk candidates per gt) ----
        # TODO(synk): torch.topk tie ordering is not reproduced bit-exactly.
        if n_tiles == 1:
            topk_idxs = tk_idxs[:, 0]                                      # (bs, nm, topk)
        else:
            vals_m = jnp.transpose(tk_vals, (0, 2, 1, 3)).reshape(bs, nm, n_tiles * self.topk)
            idxs_m = jnp.transpose(tk_idxs, (0, 2, 1, 3)).reshape(bs, nm, n_tiles * self.topk)
            _, pos = lax.top_k(vals_m, self.topk)
            topk_idxs = jnp.take_along_axis(idxs_m, pos, axis=-1)          # (bs, nm, topk)

        # ---- Kernel 2: mask_pos + select_highest_overlaps + normalization reductions ----
        kern2 = partial(_assign_kernel, eps=self.eps, topk=self.topk, tile_na=tile_na)
        tgt_pad, fg_pad, amsel_pad, pos_a, pos_o = pl.pallas_call(
            kern2,
            grid=(bs, n_tiles),
            in_specs=[
                pl.BlockSpec((1, nm, tile_na), lambda b, t: (b, 0, t)),
                pl.BlockSpec((1, nm, tile_na), lambda b, t: (b, 0, t)),
                pl.BlockSpec((1, nm, self.topk), lambda b, t: (b, 0, 0)),
                pl.BlockSpec((1, nm, 8), lambda b, t: (b, 0, 0)),
                pl.BlockSpec((2, tile_na), lambda b, t: (0, t)),
            ],
            out_specs=[
                pl.BlockSpec((1, 1, tile_na), lambda b, t: (b, 0, t)),
                pl.BlockSpec((1, 1, tile_na), lambda b, t: (b, 0, t)),
                pl.BlockSpec((1, 1, tile_na), lambda b, t: (b, 0, t)),
                pl.BlockSpec((1, 1, nm, 1), lambda b, t: (b, t, 0, 0)),
                pl.BlockSpec((1, 1, nm, 1), lambda b, t: (b, t, 0, 0)),
            ],
            out_shape=[
                jax.ShapeDtypeStruct((bs, 1, na_pad), jnp.int32),
                jax.ShapeDtypeStruct((bs, 1, na_pad), f32),
                jax.ShapeDtypeStruct((bs, 1, na_pad), f32),
                jax.ShapeDtypeStruct((bs, n_tiles, nm, 1), f32),
                jax.ShapeDtypeStruct((bs, n_tiles, nm, 1), f32),
            ],
            compiler_params=pltpu.CompilerParams(
                dimension_semantics=("parallel", "parallel"),
                vmem_limit_bytes=vmem_limit),
        )(align_metric, overlaps, topk_idxs, gt_pack, anc_t)

        target_gt_idx = tgt_pad[:, 0, :na]                                 # (bs, na) int32
        fg_mask = fg_pad[:, 0, :na]                                        # (bs, na) f32
        am_sel = amsel_pad[:, 0, :na]                                      # (bs, na) f32

        # cross-tile max of the per-gt partials (tiny)
        pos_align = jnp.max(pos_a[..., 0], axis=1)                         # (bs, nm)
        pos_ov = jnp.max(pos_o[..., 0], axis=1)                            # (bs, nm)

        # norm_align_metric: after dedup each anchor has at most one assigned gt, so the
        # reference's amax over gts collapses to a gather of the per-gt ratio.
        ratio = pos_ov / (pos_align + self.eps)                            # (bs, nm)
        norm_align = am_sel * jnp.take_along_axis(ratio, target_gt_idx, axis=1)
        if nm > 1:
            norm_align = jnp.maximum(norm_align, 0.0)

        # ---- get_targets (glue: gathers / one-hot, no repeats or int round trips) ----
        batch_ind = jnp.arange(bs, dtype=jnp.int32)[:, None]
        flat_idx = target_gt_idx + batch_ind * nm                          # (bs, na)
        target_labels = jnp.maximum(gt_labels_i.reshape(-1)[flat_idx], 0)  # (bs, na)
        target_bboxes = gt_bboxes_f.reshape(-1, 4)[flat_idx]               # (bs, na, 4)
        onehot_t = jax.nn.one_hot(target_labels, self.num_classes, dtype=f32)
        target_scores = jnp.where(fg_mask[:, :, None] > 0, onehot_t, 0.0) * norm_align[..., None]

        return (target_labels, target_bboxes, target_scores,
                fg_mask > 0, target_gt_idx)


if __name__ == "__main__":
    key = jax.random.PRNGKey(0)
    bs, n_max, nc, topk = 2, 8, 20, 13
    gh = gw = 16
    na = gh * gw
    stride = 8.0

    # anchor centers
    ys, xs = jnp.meshgrid(jnp.arange(gh, dtype=jnp.float32),
                          jnp.arange(gw, dtype=jnp.float32), indexing="ij")
    anc_points = jnp.stack([(xs.reshape(-1) + 0.5) * stride,
                            (ys.reshape(-1) + 0.5) * stride], axis=-1)      # (na, 2)

    k1, k2, k3, k4, k5 = jax.random.split(key, 5)
    pd_scores = jax.nn.sigmoid(jax.random.normal(k1, (bs, na, nc), jnp.float32))
    off = jax.random.uniform(k2, (bs, na, 4), jnp.float32, 2.0, 24.0)
    ctr = anc_points[None]                                                  # (1, na, 2)
    pd_bboxes = jnp.concatenate([ctr - off[..., :2], ctr + off[..., 2:]], axis=-1)

    xy1 = jax.random.uniform(k3, (bs, n_max, 2), jnp.float32, 0.0, 96.0)
    wh = jax.random.uniform(k4, (bs, n_max, 2), jnp.float32, 12.0, 48.0)
    gt_bboxes = jnp.concatenate([xy1, xy1 + wh], axis=-1)                   # (bs, n_max, 4)
    gt_labels = jax.random.randint(k5, (bs, n_max, 1), 0, nc).astype(jnp.int32)
    n_valid = jnp.array([[5], [3]], dtype=jnp.int32)                        # (bs, 1)
    mask_gt = (jnp.arange(n_max)[None, :, None] < n_valid[:, :, None]).astype(jnp.float32)

    assigner = TaskAlignedAssignerPallas(topk=topk, num_classes=nc)
    outs = assigner(pd_scores, pd_bboxes, anc_points, gt_labels, gt_bboxes, mask_gt)
    jax.block_until_ready(outs)
    print("KERNEL_OK")
</pallas_src>

<mosaic_0001>
module attributes {stable_mosaic.version = 11 : i64} {
  func.func @_metrics_kernel(%arg0: i32, %arg1: i32, %arg2: memref<1x256x20xbf16, #tpu.memory_space<vmem>>, %arg3: memref<1x8x256xf32, #tpu.memory_space<vmem>>, %arg4: memref<1x8x8xf32, #tpu.memory_space<vmem>>, %arg5: memref<1x8x256xf32, #tpu.memory_space<vmem>>, %arg6: memref<1x8x256xf32, #tpu.memory_space<vmem>>, %arg7: memref<1x1x8x13xf32, #tpu.memory_space<vmem>>, %arg8: memref<1x1x8x13xi32, #tpu.memory_space<vmem>>) attributes {dimension_semantics = [#tpu.dimension_semantics<parallel>, #tpu.dimension_semantics<parallel>], iteration_bounds = array<i64: 2, 1>, scalar_prefetch = 0 : i64, scratch_operands = 0 : i64, tpu.core_type = #tpu.core_type<tc>, window_params = [{transform_indices = @transform_0, window_bounds = array<i64: 1, 256, 20>}, {transform_indices = @transform_1, window_bounds = array<i64: 1, 8, 256>}, {transform_indices = @transform_2, window_bounds = array<i64: 1, 8, 8>}, {transform_indices = @transform_3, window_bounds = array<i64: 1, 8, 256>}, {transform_indices = @transform_4, window_bounds = array<i64: 1, 8, 256>}, {transform_indices = @transform_5, window_bounds = array<i64: 1, 1, 8, 13>}, {transform_indices = @transform_6, window_bounds = array<i64: 1, 1, 8, 13>}]} {
    %c0 = arith.constant 0 : index
    %c0_0 = arith.constant 0 : index
    %c0_1 = arith.constant 0 : index
    %0 = vector.load %arg2[%c0, %c0_0, %c0_1] : memref<1x256x20xbf16, #tpu.memory_space<vmem>>, vector<1x256x20xbf16>
    %1 = vector.shape_cast %0 : vector<1x256x20xbf16> to vector<256x20xbf16>
    %c0_2 = arith.constant 0 : index
    %c0_3 = arith.constant 0 : index
    %c0_4 = arith.constant 0 : index
    %2 = vector.load %arg3[%c0_2, %c0_3, %c0_4] : memref<1x8x256xf32, #tpu.memory_space<vmem>>, vector<1x8x256xf32>
    %3 = vector.shape_cast %2 : vector<1x8x256xf32> to vector<8x256xf32>
    %c0_5 = arith.constant 0 : index
    %c0_6 = arith.constant 0 : index
    %c0_7 = arith.constant 0 : index
    %4 = vector.load %arg4[%c0_5, %c0_6, %c0_7] : memref<1x8x8xf32, #tpu.memory_space<vmem>>, vector<1x8x8xf32>
    %5 = vector.shape_cast %4 : vector<1x8x8xf32> to vector<8x8xf32>
    %6 = vector.extract_strided_slice %5 {offsets = [0, 0], sizes = [8, 1], strides = [1, 1]} : vector<8x8xf32> to vector<8x1xf32>
    %7 = vector.extract_strided_slice %5 {offsets = [0, 1], sizes = [8, 1], strides = [1, 1]} : vector<8x8xf32> to vector<8x1xf32>
    %8 = vector.extract_strided_slice %5 {offsets = [0, 2], sizes = [8, 1], strides = [1, 1]} : vector<8x8xf32> to vector<8x1xf32>
    %9 = vector.extract_strided_slice %5 {offsets = [0, 3], sizes = [8, 1], strides = [1, 1]} : vector<8x8xf32> to vector<8x1xf32>
    %10 = vector.extract_strided_slice %5 {offsets = [0, 4], sizes = [8, 1], strides = [1, 1]} : vector<8x8xf32> to vector<8x1xf32>
    %11 = arith.fptosi %10 : vector<8x1xf32> to vector<8x1xi32>
    %12 = vector.extract_strided_slice %5 {offsets = [0, 5], sizes = [8, 1], strides = [1, 1]} : vector<8x8xf32> to vector<8x1xf32>
    %13 = vector.extract_strided_slice %5 {offsets = [0, 6], sizes = [8, 1], strides = [1, 1]} : vector<8x8xf32> to vector<8x1xf32>
    %14 = vector.extract_strided_slice %3 {offsets = [0, 0], sizes = [1, 256], strides = [1, 1]} : vector<8x256xf32> to vector<1x256xf32>
    %15 = vector.extract_strided_slice %3 {offsets = [1, 0], sizes = [1, 256], strides = [1, 1]} : vector<8x256xf32> to vector<1x256xf32>
    %16 = vector.extract_strided_slice %3 {offsets = [2, 0], sizes = [1, 256], strides = [1, 1]} : vector<8x256xf32> to vector<1x256xf32>
    %17 = vector.extract_strided_slice %3 {offsets = [3, 0], sizes = [1, 256], strides = [1, 1]} : vector<8x256xf32> to vector<1x256xf32>
    %18 = vector.extract_strided_slice %3 {offsets = [4, 0], sizes = [1, 256], strides = [1, 1]} : vector<8x256xf32> to vector<1x256xf32>
    %19 = vector.extract_strided_slice %3 {offsets = [5, 0], sizes = [1, 256], strides = [1, 1]} : vector<8x256xf32> to vector<1x256xf32>
    %20 = vector.extract_strided_slice %3 {offsets = [6, 0], sizes = [1, 256], strides = [1, 1]} : vector<8x256xf32> to vector<1x256xf32>
    %21 = vector.broadcast %19 : vector<1x256xf32> to vector<8x256xf32>
    %22 = vector.broadcast %6 : vector<8x1xf32> to vector<8x256xf32>
    %23 = arith.subf %21, %22 : vector<8x256xf32>
    %24 = vector.broadcast %20 : vector<1x256xf32> to vector<8x256xf32>
    %25 = vector.broadcast %7 : vector<8x1xf32> to vector<8x256xf32>
    %26 = arith.subf %24, %25 : vector<8x256xf32>
    %27 = arith.minimumf %23, %26 : vector<8x256xf32>
    %28 = vector.broadcast %8 : vector<8x1xf32> to vector<8x256xf32>
    %29 = vector.broadcast %19 : vector<1x256xf32> to vector<8x256xf32>
    %30 = arith.subf %28, %29 : vector<8x256xf32>
    %31 = vector.broadcast %9 : vector<8x1xf32> to vector<8x256xf32>
    %32 = vector.broadcast %20 : vector<1x256xf32> to vector<8x256xf32>
    %33 = arith.subf %31, %32 : vector<8x256xf32>
    %34 = arith.minimumf %30, %33 : vector<8x256xf32>
    %35 = arith.minimumf %27, %34 : vector<8x256xf32>
    %cst = arith.constant 9.99999971E-10 : f32
    %36 = vector.broadcast %cst : f32 to vector<8x256xf32>
    %37 = arith.cmpf ogt, %35, %36 : vector<8x256xf32>
    %cst_8 = arith.constant 0.000000e+00 : f32
    %38 = vector.broadcast %cst_8 : f32 to vector<8x1xf32>
    %39 = arith.cmpf ogt, %12, %38 : vector<8x1xf32>
    %40 = vector.broadcast %39 : vector<8x1xi1> to vector<8x256xi1>
    %41 = arith.andi %37, %40 : vector<8x256xi1>
    %42 = tpu.iota {dimensions = array<i32: 1>} : vector<8x20xi32>
    %43 = vector.broadcast %11 : vector<8x1xi32> to vector<8x20xi32>
    %44 = arith.cmpi eq, %42, %43 : vector<8x20xi32>
    %45 = arith.extui %44 : vector<8x20xi1> to vector<8x20xi32>
    %46 = arith.sitofp %45 : vector<8x20xi32> to vector<8x20xf32>
    %47 = arith.truncf %46 : vector<8x20xf32> to vector<8x20xbf16>
    %cst_9 = arith.constant dense<0.000000e+00> : vector<8x256xf32>
    %48 = tpu.matmul %47, %1, %cst_9 {dimension_numbers = #tpu.dot_dimension_numbers<[1], [1], [0], [0], [0, 0, 1, 0], [], []>} : vector<8x20xbf16>, vector<256x20xbf16>, vector<8x256xf32> -> vector<8x256xf32>
    %cst_10 = arith.constant 0.000000e+00 : f32
    %49 = vector.broadcast %cst_10 : f32 to vector<8x256xf32>
    %50 = arith.select %41, %48, %49 : vector<8x256xi1>, vector<8x256xf32>
    %51 = arith.subf %8, %6 : vector<8x1xf32>
    %52 = arith.subf %9, %7 : vector<8x1xf32>
    %cst_11 = arith.constant 1.000000e-07 : f32
    %53 = vector.broadcast %cst_11 : f32 to vector<8x1xf32>
    %54 = arith.addf %52, %53 : vector<8x1xf32>
    %55 = arith.subf %16, %14 : vector<1x256xf32>
    %56 = arith.subf %17, %15 : vector<1x256xf32>
    %cst_12 = arith.constant 1.000000e-07 : f32
    %57 = vector.broadcast %cst_12 : f32 to vector<1x256xf32>
    %58 = arith.addf %56, %57 : vector<1x256xf32>
    %59 = vector.broadcast %8 : vector<8x1xf32> to vector<8x256xf32>
    %60 = vector.broadcast %16 : vector<1x256xf32> to vector<8x256xf32>
    %61 = arith.minimumf %59, %60 : vector<8x256xf32>
    %62 = vector.broadcast %6 : vector<8x1xf32> to vector<8x256xf32>
    %63 = vector.broadcast %14 : vector<1x256xf32> to vector<8x256xf32>
    %64 = arith.maximumf %62, %63 : vector<8x256xf32>
    %65 = arith.subf %61, %64 : vector<8x256xf32>
    %cst_13 = arith.constant 0.000000e+00 : f32
    %66 = vector.broadcast %cst_13 : f32 to vector<8x256xf32>
    %67 = arith.maximumf %65, %66 : vector<8x256xf32>
    %68 = vector.broadcast %9 : vector<8x1xf32> to vector<8x256xf32>
    %69 = vector.broadcast %17 : vector<1x256xf32> to vector<8x256xf32>
    %70 = arith.minimumf %68, %69 : vector<8x256xf32>
    %71 = vector.broadcast %7 : vector<8x1xf32> to vector<8x256xf32>
    %72 = vector.broadcast %15 : vector<1x256xf32> to vector<8x256xf32>
    %73 = arith.maximumf %71, %72 : vector<8x256xf32>
    %74 = arith.subf %70, %73 : vector<8x256xf32>
    %cst_14 = arith.constant 0.000000e+00 : f32
    %75 = vector.broadcast %cst_14 : f32 to vector<8x256xf32>
    %76 = arith.maximumf %74, %75 : vector<8x256xf32>
    %77 = arith.mulf %67, %76 : vector<8x256xf32>
    %78 = arith.mulf %51, %54 : vector<8x1xf32>
    %79 = arith.mulf %55, %58 : vector<1x256xf32>
    %80 = vector.broadcast %78 : vector<8x1xf32> to vector<8x256xf32>
    %81 = vector.broadcast %79 : vector<1x256xf32> to vector<8x256xf32>
    %82 = arith.addf %80, %81 : vector<8x256xf32>
    %83 = arith.subf %82, %77 : vector<8x256xf32>
    %cst_15 = arith.constant 1.000000e-07 : f32
    %84 = vector.broadcast %cst_15 : f32 to vector<8x256xf32>
    %85 = arith.addf %83, %84 : vector<8x256xf32>
    %86 = arith.divf %77, %85 : vector<8x256xf32>
    %87 = vector.broadcast %8 : vector<8x1xf32> to vector<8x256xf32>
    %88 = vector.broadcast %16 : vector<1x256xf32> to vector<8x256xf32>
    %89 = arith.maximumf %87, %88 : vector<8x256xf32>
    %90 = vector.broadcast %6 : vector<8x1xf32> to vector<8x256xf32>
    %91 = vector.broadcast %14 : vector<1x256xf32> to vector<8x256xf32>
    %92 = arith.minimumf %90, %91 : vector<8x256xf32>
    %93 = arith.subf %89, %92 : vector<8x256xf32>
    %94 = vector.broadcast %9 : vector<8x1xf32> to vector<8x256xf32>
    %95 = vector.broadcast %17 : vector<1x256xf32> to vector<8x256xf32>
    %96 = arith.maximumf %94, %95 : vector<8x256xf32>
    %97 = vector.broadcast %7 : vector<8x1xf32> to vector<8x256xf32>
    %98 = vector.broadcast %15 : vector<1x256xf32> to vector<8x256xf32>
    %99 = arith.minimumf %97, %98 : vector<8x256xf32>
    %100 = arith.subf %96, %99 : vector<8x256xf32>
    %101 = arith.mulf %93, %93 : vector<8x256xf32>
    %102 = arith.mulf %100, %100 : vector<8x256xf32>
    %103 = arith.addf %101, %102 : vector<8x256xf32>
    %cst_16 = arith.constant 1.000000e-07 : f32
    %104 = vector.broadcast %cst_16 : f32 to vector<8x256xf32>
    %105 = arith.addf %103, %104 : vector<8x256xf32>
    %106 = arith.addf %14, %16 : vector<1x256xf32>
    %107 = vector.broadcast %106 : vector<1x256xf32> to vector<8x256xf32>
    %108 = vector.broadcast %6 : vector<8x1xf32> to vector<8x256xf32>
    %109 = arith.subf %107, %108 : vector<8x256xf32>
    %110 = vector.broadcast %8 : vector<8x1xf32> to vector<8x256xf32>
    %111 = arith.subf %109, %110 : vector<8x256xf32>
    %112 = arith.mulf %111, %111 : vector<8x256xf32>
    %113 = arith.addf %15, %17 : vector<1x256xf32>
    %114 = vector.broadcast %113 : vector<1x256xf32> to vector<8x256xf32>
    %115 = vector.broadcast %7 : vector<8x1xf32> to vector<8x256xf32>
    %116 = arith.subf %114, %115 : vector<8x256xf32>
    %117 = vector.broadcast %9 : vector<8x1xf32> to vector<8x256xf32>
    %118 = arith.subf %116, %117 : vector<8x256xf32>
    %119 = arith.mulf %118, %118 : vector<8x256xf32>
    %120 = arith.addf %112, %119 : vector<8x256xf32>
    %cst_17 = arith.constant 2.500000e-01 : f32
    %121 = vector.broadcast %cst_17 : f32 to vector<8x256xf32>
    %122 = arith.mulf %120, %121 : vector<8x256xf32>
    %123 = vector.broadcast %18 : vector<1x256xf32> to vector<8x256xf32>
    %124 = vector.broadcast %13 : vector<8x1xf32> to vector<8x256xf32>
    %125 = arith.subf %123, %124 : vector<8x256xf32>
    %126 = arith.mulf %125, %125 : vector<8x256xf32>
    %cst_18 = arith.constant 0.405284733 : f32
    %127 = vector.broadcast %cst_18 : f32 to vector<8x256xf32>
    %128 = arith.mulf %127, %126 : vector<8x256xf32>
    %129 = arith.subf %128, %86 : vector<8x256xf32>
    %cst_19 = arith.constant 1.00000012 : f32
    %130 = vector.broadcast %cst_19 : f32 to vector<8x256xf32>
    %131 = arith.addf %129, %130 : vector<8x256xf32>
    %132 = arith.divf %128, %131 : vector<8x256xf32>
    %133 = arith.divf %122, %105 : vector<8x256xf32>
    %134 = arith.mulf %128, %132 : vector<8x256xf32>
    %135 = arith.addf %133, %134 : vector<8x256xf32>
    %136 = arith.subf %86, %135 : vector<8x256xf32>
    %cst_20 = arith.constant 0.000000e+00 : f32
    %137 = vector.broadcast %cst_20 : f32 to vector<8x256xf32>
    %138 = arith.maximumf %136, %137 : vector<8x256xf32>
    %cst_21 = arith.constant 0.000000e+00 : f32
    %139 = vector.broadcast %cst_21 : f32 to vector<8x256xf32>
    %140 = arith.select %41, %138, %139 : vector<8x256xi1>, vector<8x256xf32>
    %141 = arith.mulf %140, %140 : vector<8x256xf32>
    %142 = arith.mulf %141, %141 : vector<8x256xf32>
    %143 = arith.mulf %141, %142 : vector<8x256xf32>
    %144 = arith.mulf %50, %143 : vector<8x256xf32>
    %c256_i32 = arith.constant 256 : i32
    %145 = arith.muli %arg1, %c256_i32 : i32
    %146 = tpu.iota {dimensions = array<i32: 1>} : vector<1x256xi32>
    %147 = vector.broadcast %145 : i32 to vector<1x256xi32>
    %148 = arith.addi %147, %146 : vector<1x256xi32>
    %c0_22 = arith.constant 0 : index
    %c0_23 = arith.constant 0 : index
    %c0_24 = arith.constant 0 : index
    %149 = vector.load %arg5[%c0_22, %c0_23, %c0_24] : memref<1x8x256xf32, #tpu.memory_space<vmem>>, vector<1x8x256xf32>
    %150 = vector.shape_cast %149 : vector<1x8x256xf32> to vector<8x256xf32>
    %151 = vector.shape_cast %144 : vector<8x256xf32> to vector<1x8x256xf32>
    tpu.vector_store %arg5[%c0_22, %c0_23, %c0_24], %151 {strides = array<i32>} : memref<1x8x256xf32, #tpu.memory_space<vmem>>, vector<1x8x256xf32>,
    %c0_25 = arith.constant 0 : index
    %c0_26 = arith.constant 0 : index
    %c0_27 = arith.constant 0 : index
    %152 = vector.load %arg6[%c0_25, %c0_26, %c0_27] : memref<1x8x256xf32, #tpu.memory_space<vmem>>, vector<1x8x256xf32>
    %153 = vector.shape_cast %152 : vector<1x8x256xf32> to vector<8x256xf32>
    %154 = vector.shape_cast %140 : vector<8x256xf32> to vector<1x8x256xf32>
    tpu.vector_store %arg6[%c0_25, %c0_26, %c0_27], %154 {strides = array<i32>} : memref<1x8x256xf32, #tpu.memory_space<vmem>>, vector<1x8x256xf32>,
    %155 = vector.shape_cast %148 : vector<1x256xi32> to vector<1x256xi32>
    %156 = vector.broadcast %155 : vector<1x256xi32> to vector<8x256xi32>
    %157 = tpu.iota {dimensions = array<i32: 1>} : vector<8x13xi32>
    %cst_28 = arith.constant 0.000000e+00 : f32
    %158 = vector.broadcast %cst_28 : f32 to vector<8x13xf32>
    %c0_i32 = arith.constant 0 : i32
    %159 = vector.broadcast %c0_i32 : i32 to vector<8x13xi32>
    %cst_29 = arith.constant dense<0xFF800000> : vector<8xf32>
    %160 = vector.multi_reduction <maximumf>, %144, %cst_29 [1] : vector<8x256xf32> to vector<8xf32>
    %161 = vector.shape_cast %160 : vector<8xf32> to vector<8x1xf32>
    %162 = vector.broadcast %161 : vector<8x1xf32> to vector<8x256xf32>
    %163 = arith.cmpf oeq, %144, %162 : vector<8x256xf32>
    %c2147483647_i32 = arith.constant 2147483647 : i32
    %164 = vector.broadcast %c2147483647_i32 : i32 to vector<8x256xi32>
    %165 = arith.select %163, %156, %164 : vector<8x256xi1>, vector<8x256xi32>
    %cst_30 = arith.constant dense<2147483647> : vector<8xi32>
    %166 = vector.multi_reduction <minsi>, %165, %cst_30 [1] : vector<8x256xi32> to vector<8xi32>
    %167 = vector.shape_cast %166 : vector<8xi32> to vector<8x1xi32>
    %c0_i32_31 = arith.constant 0 : i32
    %168 = vector.broadcast %c0_i32_31 : i32 to vector<8x13xi32>
    %169 = arith.cmpi eq, %157, %168 : vector<8x13xi32>
    %170 = vector.shape_cast %161 : vector<8x1xf32> to vector<8x1xf32>
    %171 = vector.broadcast %170 : vector<8x1xf32> to vector<8x13xf32>
    %172 = arith.select %169, %171, %158 : vector<8x13xi1>, vector<8x13xf32>
    %c0_i32_32 = arith.constant 0 : i32
    %173 = vector.broadcast %c0_i32_32 : i32 to vector<8x13xi32>
    %174 = arith.cmpi eq, %157, %173 : vector<8x13xi32>
    %175 = vector.shape_cast %167 : vector<8x1xi32> to vector<8x1xi32>
    %176 = vector.broadcast %175 : vector<8x1xi32> to vector<8x13xi32>
    %177 = arith.select %174, %176, %159 : vector<8x13xi1>, vector<8x13xi32>
    %178 = vector.broadcast %167 : vector<8x1xi32> to vector<8x256xi32>
    %179 = arith.cmpi eq, %156, %178 : vector<8x256xi32>
    %cst_33 = arith.constant -3.000000e+38 : f32
    %180 = vector.broadcast %cst_33 : f32 to vector<8x256xf32>
    %181 = arith.select %179, %180, %144 : vector<8x256xi1>, vector<8x256xf32>
    %cst_34 = arith.constant dense<0xFF800000> : vector<8xf32>
    %182 = vector.multi_reduction <maximumf>, %181, %cst_34 [1] : vector<8x256xf32> to vector<8xf32>
    %183 = vector.shape_cast %182 : vector<8xf32> to vector<8x1xf32>
    %184 = vector.broadcast %183 : vector<8x1xf32> to vector<8x256xf32>
    %185 = arith.cmpf oeq, %181, %184 : vector<8x256xf32>
    %c2147483647_i32_35 = arith.constant 2147483647 : i32
    %186 = vector.broadcast %c2147483647_i32_35 : i32 to vector<8x256xi32>
    %187 = arith.select %185, %156, %186 : vector<8x256xi1>, vector<8x256xi32>
    %cst_36 = arith.constant dense<2147483647> : vector<8xi32>
    %188 = vector.multi_reduction <minsi>, %187, %cst_36 [1] : vector<8x256xi32> to vector<8xi32>
    %189 = vector.shape_cast %188 : vector<8xi32> to vector<8x1xi32>
    %c1_i32 = arith.constant 1 : i32
    %190 = vector.broadcast %c1_i32 : i32 to vector<8x13xi32>
    %191 = arith.cmpi eq, %157, %190 : vector<8x13xi32>
    %192 = vector.shape_cast %183 : vector<8x1xf32> to vector<8x1xf32>
    %193 = vector.broadcast %192 : vector<8x1xf32> to vector<8x13xf32>
    %194 = arith.select %191, %193, %172 : vector<8x13xi1>, vector<8x13xf32>
    %c1_i32_37 = arith.constant 1 : i32
    %195 = vector.broadcast %c1_i32_37 : i32 to vector<8x13xi32>
    %196 = arith.cmpi eq, %157, %195 : vector<8x13xi32>
    %197 = vector.shape_cast %189 : vector<8x1xi32> to vector<8x1xi32>
    %198 = vector.broadcast %197 : vector<8x1xi32> to vector<8x13xi32>
    %199 = arith.select %196, %198, %177 : vector<8x13xi1>, vector<8x13xi32>
    %200 = vector.broadcast %189 : vector<8x1xi32> to vector<8x256xi32>
    %201 = arith.cmpi eq, %156, %200 : vector<8x256xi32>
    %cst_38 = arith.constant -3.000000e+38 : f32
    %202 = vector.broadcast %cst_38 : f32 to vector<8x256xf32>
    %203 = arith.select %201, %202, %181 : vector<8x256xi1>, vector<8x256xf32>
    %cst_39 = arith.constant dense<0xFF800000> : vector<8xf32>
    %204 = vector.multi_reduction <maximumf>, %203, %cst_39 [1] : vector<8x256xf32> to vector<8xf32>
    %205 = vector.shape_cast %204 : vector<8xf32> to vector<8x1xf32>
    %206 = vector.broadcast %205 : vector<8x1xf32> to vector<8x256xf32>
    %207 = arith.cmpf oeq, %203, %206 : vector<8x256xf32>
    %c2147483647_i32_40 = arith.constant 2147483647 : i32
    %208 = vector.broadcast %c2147483647_i32_40 : i32 to vector<8x256xi32>
    %209 = arith.select %207, %156, %208 : vector<8x256xi1>, vector<8x256xi32>
    %cst_41 = arith.constant dense<2147483647> : vector<8xi32>
    %210 = vector.multi_reduction <minsi>, %209, %cst_41 [1] : vector<8x256xi32> to vector<8xi32>
    %211 = vector.shape_cast %210 : vector<8xi32> to vector<8x1xi32>
    %c2_i32 = arith.constant 2 : i32
    %212 = vector.broadcast %c2_i32 : i32 to vector<8x13xi32>
    %213 = arith.cmpi eq, %157, %212 : vector<8x13xi32>
    %214 = vector.shape_cast %205 : vector<8x1xf32> to vector<8x1xf32>
    %215 = vector.broadcast %214 : vector<8x1xf32> to vector<8x13xf32>
    %216 = arith.select %213, %215, %194 : vector<8x13xi1>, vector<8x13xf32>
    %c2_i32_42 = arith.constant 2 : i32
    %217 = vector.broadcast %c2_i32_42 : i32 to vector<8x13xi32>
    %218 = arith.cmpi eq, %157, %217 : vector<8x13xi32>
    %219 = vector.shape_cast %211 : vector<8x1xi32> to vector<8x1xi32>
    %220 = vector.broadcast %219 : vector<8x1xi32> to vector<8x13xi32>
    %221 = arith.select %218, %220, %199 : vector<8x13xi1>, vector<8x13xi32>
    %222 = vector.broadcast %211 : vector<8x1xi32> to vector<8x256xi32>
    %223 = arith.cmpi eq, %156, %222 : vector<8x256xi32>
    %cst_43 = arith.constant -3.000000e+38 : f32
    %224 = vector.broadcast %cst_43 : f32 to vector<8x256xf32>
    %225 = arith.select %223, %224, %203 : vector<8x256xi1>, vector<8x256xf32>
    %cst_44 = arith.constant dense<0xFF800000> : vector<8xf32>
    %226 = vector.multi_reduction <maximumf>, %225, %cst_44 [1] : vector<8x256xf32> to vector<8xf32>
    %227 = vector.shape_cast %226 : vector<8xf32> to vector<8x1xf32>
    %228 = vector.broadcast %227 : vector<8x1xf32> to vector<8x256xf32>
    %229 = arith.cmpf oeq, %225, %228 : vector<8x256xf32>
    %c2147483647_i32_45 = arith.constant 2147483647 : i32
    %230 = vector.broadcast %c2147483647_i32_45 : i32 to vector<8x256xi32>
    %231 = arith.select %229, %156, %230 : vector<8x256xi1>, vector<8x256xi32>
    %cst_46 = arith.constant dense<2147483647> : vector<8xi32>
    %232 = vector.multi_reduction <minsi>, %231, %cst_46 [1] : vector<8x256xi32> to vector<8xi32>
    %233 = vector.shape_cast %232 : vector<8xi32> to vector<8x1xi32>
    %c3_i32 = arith.constant 3 : i32
    %234 = vector.broadcast %c3_i32 : i32 to vector<8x13xi32>
    %235 = arith.cmpi eq, %157, %234 : vector<8x13xi32>
    %236 = vector.shape_cast %227 : vector<8x1xf32> to vector<8x1xf32>
    %237 = vector.broadcast %236 : vector<8x1xf32> to vector<8x13xf32>
    %238 = arith.select %235, %237, %216 : vector<8x13xi1>, vector<8x13xf32>
    %c3_i32_47 = arith.constant 3 : i32
    %239 = vector.broadcast %c3_i32_47 : i32 to vector<8x13xi32>
    %240 = arith.cmpi eq, %157, %239 : vector<8x13xi32>
    %241 = vector.shape_cast %233 : vector<8x1xi32> to vector<8x1xi32>
    %242 = vector.broadcast %241 : vector<8x1xi32> to vector<8x13xi32>
    %243 = arith.select %240, %242, %221 : vector<8x13xi1>, vector<8x13xi32>
    %244 = vector.broadcast %233 : vector<8x1xi32> to vector<8x256xi32>
    %245 = arith.cmpi eq, %156, %244 : vector<8x256xi32>
    %cst_48 = arith.constant -3.000000e+38 : f32
    %246 = vector.broadcast %cst_48 : f32 to vector<8x256xf32>
    %247 = arith.select %245, %246, %225 : vector<8x256xi1>, vector<8x256xf32>
    %cst_49 = arith.constant dense<0xFF800000> : vector<8xf32>
    %248 = vector.multi_reduction <maximumf>, %247, %cst_49 [1] : vector<8x256xf32> to vector<8xf32>
    %249 = vector.shape_cast %248 : vector<8xf32> to vector<8x1xf32>
    %250 = vector.broadcast %249 : vector<8x1xf32> to vector<8x256xf32>
    %251 = arith.cmpf oeq, %247, %250 : vector<8x256xf32>
    %c2147483647_i32_50 = arith.constant 2147483647 : i32
    %252 = vector.broadcast %c2147483647_i32_50 : i32 to vector<8x256xi32>
    %253 = arith.select %251, %156, %252 : vector<8x256xi1>, vector<8x256xi32>
    %cst_51 = arith.constant dense<2147483647> : vector<8xi32>
    %254 = vector.multi_reduction <minsi>, %253, %cst_51 [1] : vector<8x256xi32> to vector<8xi32>
    %255 = vector.shape_cast %254 : vector<8xi32> to vector<8x1xi32>
    %c4_i32 = arith.constant 4 : i32
    %256 = vector.broadcast %c4_i32 : i32 to vector<8x13xi32>
    %257 = arith.cmpi eq, %157, %256 : vector<8x13xi32>
    %258 = vector.shape_cast %249 : vector<8x1xf32> to vector<8x1xf32>
    %259 = vector.broadcast %258 : vector<8x1xf32> to vector<8x13xf32>
    %260 = arith.select %257, %259, %238 : vector<8x13xi1>, vector<8x13xf32>
    %c4_i32_52 = arith.constant 4 : i32
    %261 = vector.broadcast %c4_i32_52 : i32 to vector<8x13xi32>
    %262 = arith.cmpi eq, %157, %261 : vector<8x13xi32>
    %263 = vector.shape_cast %255 : vector<8x1xi32> to vector<8x1xi32>
    %264 = vector.broadcast %263 : vector<8x1xi32> to vector<8x13xi32>
    %265 = arith.select %262, %264, %243 : vector<8x13xi1>, vector<8x13xi32>
    %266 = vector.broadcast %255 : vector<8x1xi32> to vector<8x256xi32>
    %267 = arith.cmpi eq, %156, %266 : vector<8x256xi32>
    %cst_53 = arith.constant -3.000000e+38 : f32
    %268 = vector.broadcast %cst_53 : f32 to vector<8x256xf32>
    %269 = arith.select %267, %268, %247 : vector<8x256xi1>, vector<8x256xf32>
    %cst_54 = arith.constant dense<0xFF800000> : vector<8xf32>
    %270 = vector.multi_reduction <maximumf>, %269, %cst_54 [1] : vector<8x256xf32> to vector<8xf32>
    %271 = vector.shape_cast %270 : vector<8xf32> to vector<8x1xf32>
    %272 = vector.broadcast %271 : vector<8x1xf32> to vector<8x256xf32>
    %273 = arith.cmpf oeq, %269, %272 : vector<8x256xf32>
    %c2147483647_i32_55 = arith.constant 2147483647 : i32
    %274 = vector.broadcast %c2147483647_i32_55 : i32 to vector<8x256xi32>
    %275 = arith.select %273, %156, %274 : vector<8x256xi1>, vector<8x256xi32>
    %cst_56 = arith.constant dense<2147483647> : vector<8xi32>
    %276 = vector.multi_reduction <minsi>, %275, %cst_56 [1] : vector<8x256xi32> to vector<8xi32>
    %277 = vector.shape_cast %276 : vector<8xi32> to vector<8x1xi32>
    %c5_i32 = arith.constant 5 : i32
    %278 = vector.broadcast %c5_i32 : i32 to vector<8x13xi32>
    %279 = arith.cmpi eq, %157, %278 : vector<8x13xi32>
    %280 = vector.shape_cast %271 : vector<8x1xf32> to vector<8x1xf32>
    %281 = vector.broadcast %280 : vector<8x1xf32> to vector<8x13xf32>
    %282 = arith.select %279, %281, %260 : vector<8x13xi1>, vector<8x13xf32>
    %c5_i32_57 = arith.constant 5 : i32
    %283 = vector.broadcast %c5_i32_57 : i32 to vector<8x13xi32>
    %284 = arith.cmpi eq, %157, %283 : vector<8x13xi32>
    %285 = vector.shape_cast %277 : vector<8x1xi32> to vector<8x1xi32>
    %286 = vector.broadcast %285 : vector<8x1xi32> to vector<8x13xi32>
    %287 = arith.select %284, %286, %265 : vector<8x13xi1>, vector<8x13xi32>
    %288 = vector.broadcast %277 : vector<8x1xi32> to vector<8x256xi32>
    %289 = arith.cmpi eq, %156, %288 : vector<8x256xi32>
    %cst_58 = arith.constant -3.000000e+38 : f32
    %290 = vector.broadcast %cst_58 : f32 to vector<8x256xf32>
    %291 = arith.select %289, %290, %269 : vector<8x256xi1>, vector<8x256xf32>
    %cst_59 = arith.constant dense<0xFF800000> : vector<8xf32>
    %292 = vector.multi_reduction <maximumf>, %291, %cst_59 [1] : vector<8x256xf32> to vector<8xf32>
    %293 = vector.shape_cast %292 : vector<8xf32> to vector<8x1xf32>
    %294 = vector.broadcast %293 : vector<8x1xf32> to vector<8x256xf32>
    %295 = arith.cmpf oeq, %291, %294 : vector<8x256xf32>
    %c2147483647_i32_60 = arith.constant 2147483647 : i32
    %296 = vector.broadcast %c2147483647_i32_60 : i32 to vector<8x256xi32>
    %297 = arith.select %295, %156, %296 : vector<8x256xi1>, vector<8x256xi32>
    %cst_61 = arith.constant dense<2147483647> : vector<8xi32>
    %298 = vector.multi_reduction <minsi>, %297, %cst_61 [1] : vector<8x256xi32> to vector<8xi32>
    %299 = vector.shape_cast %298 : vector<8xi32> to vector<8x1xi32>
    %c6_i32 = arith.constant 6 : i32
    %300 = vector.broadcast %c6_i32 : i32 to vector<8x13xi32>
    %301 = arith.cmpi eq, %157, %300 : vector<8x13xi32>
    %302 = vector.shape_cast %293 : vector<8x1xf32> to vector<8x1xf32>
    %303 = vector.broadcast %302 : vector<8x1xf32> to vector<8x13xf32>
    %304 = arith.select %301, %303, %282 : vector<8x13xi1>, vector<8x13xf32>
    %c6_i32_62 = arith.constant 6 : i32
    %305 = vector.broadcast %c6_i32_62 : i32 to vector<8x13xi32>
    %306 = arith.cmpi eq, %157, %305 : vector<8x13xi32>
    %307 = vector.shape_cast %299 : vector<8x1xi32> to vector<8x1xi32>
    %308 = vector.broadcast %307 : vector<8x1xi32> to vector<8x13xi32>
    %309 = arith.select %306, %308, %287 : vector<8x13xi1>, vector<8x13xi32>
    %310 = vector.broadcast %299 : vector<8x1xi32> to vector<8x256xi32>
    %311 = arith.cmpi eq, %156, %310 : vector<8x256xi32>
    %cst_63 = arith.constant -3.000000e+38 : f32
    %312 = vector.broadcast %cst_63 : f32 to vector<8x256xf32>
    %313 = arith.select %311, %312, %291 : vector<8x256xi1>, vector<8x256xf32>
    %cst_64 = arith.constant dense<0xFF800000> : vector<8xf32>
    %314 = vector.multi_reduction <maximumf>, %313, %cst_64 [1] : vector<8x256xf32> to vector<8xf32>
    %315 = vector.shape_cast %314 : vector<8xf32> to vector<8x1xf32>
    %316 = vector.broadcast %315 : vector<8x1xf32> to vector<8x256xf32>
    %317 = arith.cmpf oeq, %313, %316 : vector<8x256xf32>
    %c2147483647_i32_65 = arith.constant 2147483647 : i32
    %318 = vector.broadcast %c2147483647_i32_65 : i32 to vector<8x256xi32>
    %319 = arith.select %317, %156, %318 : vector<8x256xi1>, vector<8x256xi32>
    %cst_66 = arith.constant dense<2147483647> : vector<8xi32>
    %320 = vector.multi_reduction <minsi>, %319, %cst_66 [1] : vector<8x256xi32> to vector<8xi32>
    %321 = vector.shape_cast %320 : vector<8xi32> to vector<8x1xi32>
    %c7_i32 = arith.constant 7 : i32
    %322 = vector.broadcast %c7_i32 : i32 to vector<8x13xi32>
    %323 = arith.cmpi eq, %157, %322 : vector<8x13xi32>
    %324 = vector.shape_cast %315 : vector<8x1xf32> to vector<8x1xf32>
    %325 = vector.broadcast %324 : vector<8x1xf32> to vector<8x13xf32>
    %326 = arith.select %323, %325, %304 : vector<8x13xi1>, vector<8x13xf32>
    %c7_i32_67 = arith.constant 7 : i32
    %327 = vector.broadcast %c7_i32_67 : i32 to vector<8x13xi32>
    %328 = arith.cmpi eq, %157, %327 : vector<8x13xi32>
    %329 = vector.shape_cast %321 : vector<8x1xi32> to vector<8x1xi32>
    %330 = vector.broadcast %329 : vector<8x1xi32> to vector<8x13xi32>
    %331 = arith.select %328, %330, %309 : vector<8x13xi1>, vector<8x13xi32>
    %332 = vector.broadcast %321 : vector<8x1xi32> to vector<8x256xi32>
    %333 = arith.cmpi eq, %156, %332 : vector<8x256xi32>
    %cst_68 = arith.constant -3.000000e+38 : f32
    %334 = vector.broadcast %cst_68 : f32 to vector<8x256xf32>
    %335 = arith.select %333, %334, %313 : vector<8x256xi1>, vector<8x256xf32>
    %cst_69 = arith.constant dense<0xFF800000> : vector<8xf32>
    %336 = vector.multi_reduction <maximumf>, %335, %cst_69 [1] : vector<8x256xf32> to vector<8xf32>
    %337 = vector.shape_cast %336 : vector<8xf32> to vector<8x1xf32>
    %338 = vector.broadcast %337 : vector<8x1xf32> to vector<8x256xf32>
    %339 = arith.cmpf oeq, %335, %338 : vector<8x256xf32>
    %c2147483647_i32_70 = arith.constant 2147483647 : i32
    %340 = vector.broadcast %c2147483647_i32_70 : i32 to vector<8x256xi32>
    %341 = arith.select %339, %156, %340 : vector<8x256xi1>, vector<8x256xi32>
    %cst_71 = arith.constant dense<2147483647> : vector<8xi32>
    %342 = vector.multi_reduction <minsi>, %341, %cst_71 [1] : vector<8x256xi32> to vector<8xi32>
    %343 = vector.shape_cast %342 : vector<8xi32> to vector<8x1xi32>
    %c8_i32 = arith.constant 8 : i32
    %344 = vector.broadcast %c8_i32 : i32 to vector<8x13xi32>
    %345 = arith.cmpi eq, %157, %344 : vector<8x13xi32>
    %346 = vector.shape_cast %337 : vector<8x1xf32> to vector<8x1xf32>
    %347 = vector.broadcast %346 : vector<8x1xf32> to vector<8x13xf32>
    %348 = arith.select %345, %347, %326 : vector<8x13xi1>, vector<8x13xf32>
    %c8_i32_72 = arith.constant 8 : i32
    %349 = vector.broadcast %c8_i32_72 : i32 to vector<8x13xi32>
    %350 = arith.cmpi eq, %157, %349 : vector<8x13xi32>
    %351 = vector.shape_cast %343 : vector<8x1xi32> to vector<8x1xi32>
    %352 = vector.broadcast %351 : vector<8x1xi32> to vector<8x13xi32>
    %353 = arith.select %350, %352, %331 : vector<8x13xi1>, vector<8x13xi32>
    %354 = vector.broadcast %343 : vector<8x1xi32> to vector<8x256xi32>
    %355 = arith.cmpi eq, %156, %354 : vector<8x256xi32>
    %cst_73 = arith.constant -3.000000e+38 : f32
    %356 = vector.broadcast %cst_73 : f32 to vector<8x256xf32>
    %357 = arith.select %355, %356, %335 : vector<8x256xi1>, vector<8x256xf32>
    %cst_74 = arith.constant dense<0xFF800000> : vector<8xf32>
    %358 = vector.multi_reduction <maximumf>, %357, %cst_74 [1] : vector<8x256xf32> to vector<8xf32>
    %359 = vector.shape_cast %358 : vector<8xf32> to vector<8x1xf32>
    %360 = vector.broadcast %359 : vector<8x1xf32> to vector<8x256xf32>
    %361 = arith.cmpf oeq, %357, %360 : vector<8x256xf32>
    %c2147483647_i32_75 = arith.constant 2147483647 : i32
    %362 = vector.broadcast %c2147483647_i32_75 : i32 to vector<8x256xi32>
    %363 = arith.select %361, %156, %362 : vector<8x256xi1>, vector<8x256xi32>
    %cst_76 = arith.constant dense<2147483647> : vector<8xi32>
    %364 = vector.multi_reduction <minsi>, %363, %cst_76 [1] : vector<8x256xi32> to vector<8xi32>
    %365 = vector.shape_cast %364 : vector<8xi32> to vector<8x1xi32>
    %c9_i32 = arith.constant 9 : i32
    %366 = vector.broadcast %c9_i32 : i32 to vector<8x13xi32>
    %367 = arith.cmpi eq, %157, %366 : vector<8x13xi32>
    %368 = vector.shape_cast %359 : vector<8x1xf32> to vector<8x1xf32>
    %369 = vector.broadcast %368 : vector<8x1xf32> to vector<8x13xf32>
    %370 = arith.select %367, %369, %348 : vector<8x13xi1>, vector<8x13xf32>
    %c9_i32_77 = arith.constant 9 : i32
    %371 = vector.broadcast %c9_i32_77 : i32 to vector<8x13xi32>
    %372 = arith.cmpi eq, %157, %371 : vector<8x13xi32>
    %373 = vector.shape_cast %365 : vector<8x1xi32> to vector<8x1xi32>
    %374 = vector.broadcast %373 : vector<8x1xi32> to vector<8x13xi32>
    %375 = arith.select %372, %374, %353 : vector<8x13xi1>, vector<8x13xi32>
    %376 = vector.broadcast %365 : vector<8x1xi32> to vector<8x256xi32>
    %377 = arith.cmpi eq, %156, %376 : vector<8x256xi32>
    %cst_78 = arith.constant -3.000000e+38 : f32
    %378 = vector.broadcast %cst_78 : f32 to vector<8x256xf32>
    %379 = arith.select %377, %378, %357 : vector<8x256xi1>, vector<8x256xf32>
    %cst_79 = arith.constant dense<0xFF800000> : vector<8xf32>
    %380 = vector.multi_reduction <maximumf>, %379, %cst_79 [1] : vector<8x256xf32> to vector<8xf32>
    %381 = vector.shape_cast %380 : vector<8xf32> to vector<8x1xf32>
    %382 = vector.broadcast %381 : vector<8x1xf32> to vector<8x256xf32>
    %383 = arith.cmpf oeq, %379, %382 : vector<8x256xf32>
    %c2147483647_i32_80 = arith.constant 2147483647 : i32
    %384 = vector.broadcast %c2147483647_i32_80 : i32 to vector<8x256xi32>
    %385 = arith.select %383, %156, %384 : vector<8x256xi1>, vector<8x256xi32>
    %cst_81 = arith.constant dense<2147483647> : vector<8xi32>
    %386 = vector.multi_reduction <minsi>, %385, %cst_81 [1] : vector<8x256xi32> to vector<8xi32>
    %387 = vector.shape_cast %386 : vector<8xi32> to vector<8x1xi32>
    %c10_i32 = arith.constant 10 : i32
    %388 = vector.broadcast %c10_i32 : i32 to vector<8x13xi32>
    %389 = arith.cmpi eq, %157, %388 : vector<8x13xi32>
    %390 = vector.shape_cast %381 : vector<8x1xf32> to vector<8x1xf32>
    %391 = vector.broadcast %390 : vector<8x1xf32> to vector<8x13xf32>
    %392 = arith.select %389, %391, %370 : vector<8x13xi1>, vector<8x13xf32>
    %c10_i32_82 = arith.constant 10 : i32
    %393 = vector.broadcast %c10_i32_82 : i32 to vector<8x13xi32>
    %394 = arith.cmpi eq, %157, %393 : vector<8x13xi32>
    %395 = vector.shape_cast %387 : vector<8x1xi32> to vector<8x1xi32>
    %396 = vector.broadcast %395 : vector<8x1xi32> to vector<8x13xi32>
    %397 = arith.select %394, %396, %375 : vector<8x13xi1>, vector<8x13xi32>
    %398 = vector.broadcast %387 : vector<8x1xi32> to vector<8x256xi32>
    %399 = arith.cmpi eq, %156, %398 : vector<8x256xi32>
    %cst_83 = arith.constant -3.000000e+38 : f32
    %400 = vector.broadcast %cst_83 : f32 to vector<8x256xf32>
    %401 = arith.select %399, %400, %379 : vector<8x256xi1>, vector<8x256xf32>
    %cst_84 = arith.constant dense<0xFF800000> : vector<8xf32>
    %402 = vector.multi_reduction <maximumf>, %401, %cst_84 [1] : vector<8x256xf32> to vector<8xf32>
    %403 = vector.shape_cast %402 : vector<8xf32> to vector<8x1xf32>
    %404 = vector.broadcast %403 : vector<8x1xf32> to vector<8x256xf32>
    %405 = arith.cmpf oeq, %401, %404 : vector<8x256xf32>
    %c2147483647_i32_85 = arith.constant 2147483647 : i32
    %406 = vector.broadcast %c2147483647_i32_85 : i32 to vector<8x256xi32>
    %407 = arith.select %405, %156, %406 : vector<8x256xi1>, vector<8x256xi32>
    %cst_86 = arith.constant dense<2147483647> : vector<8xi32>
    %408 = vector.multi_reduction <minsi>, %407, %cst_86 [1] : vector<8x256xi32> to vector<8xi32>
    %409 = vector.shape_cast %408 : vector<8xi32> to vector<8x1xi32>
    %c11_i32 = arith.constant 11 : i32
    %410 = vector.broadcast %c11_i32 : i32 to vector<8x13xi32>
    %411 = arith.cmpi eq, %157, %410 : vector<8x13xi32>
    %412 = vector.shape_cast %403 : vector<8x1xf32> to vector<8x1xf32>
    %413 = vector.broadcast %412 : vector<8x1xf32> to vector<8x13xf32>
    %414 = arith.select %411, %413, %392 : vector<8x13xi1>, vector<8x13xf32>
    %c11_i32_87 = arith.constant 11 : i32
    %415 = vector.broadcast %c11_i32_87 : i32 to vector<8x13xi32>
    %416 = arith.cmpi eq, %157, %415 : vector<8x13xi32>
    %417 = vector.shape_cast %409 : vector<8x1xi32> to vector<8x1xi32>
    %418 = vector.broadcast %417 : vector<8x1xi32> to vector<8x13xi32>
    %419 = arith.select %416, %418, %397 : vector<8x13xi1>, vector<8x13xi32>
    %420 = vector.broadcast %409 : vector<8x1xi32> to vector<8x256xi32>
    %421 = arith.cmpi eq, %156, %420 : vector<8x256xi32>
    %cst_88 = arith.constant -3.000000e+38 : f32
    %422 = vector.broadcast %cst_88 : f32 to vector<8x256xf32>
    %423 = arith.select %421, %422, %401 : vector<8x256xi1>, vector<8x256xf32>
    %cst_89 = arith.constant dense<0xFF800000> : vector<8xf32>
    %424 = vector.multi_reduction <maximumf>, %423, %cst_89 [1] : vector<8x256xf32> to vector<8xf32>
    %425 = vector.shape_cast %424 : vector<8xf32> to vector<8x1xf32>
    %426 = vector.broadcast %425 : vector<8x1xf32> to vector<8x256xf32>
    %427 = arith.cmpf oeq, %423, %426 : vector<8x256xf32>
    %c2147483647_i32_90 = arith.constant 2147483647 : i32
    %428 = vector.broadcast %c2147483647_i32_90 : i32 to vector<8x256xi32>
    %429 = arith.select %427, %156, %428 : vector<8x256xi1>, vector<8x256xi32>
    %cst_91 = arith.constant dense<2147483647> : vector<8xi32>
    %430 = vector.multi_reduction <minsi>, %429, %cst_91 [1] : vector<8x256xi32> to vector<8xi32>
    %431 = vector.shape_cast %430 : vector<8xi32> to vector<8x1xi32>
    %c12_i32 = arith.constant 12 : i32
    %432 = vector.broadcast %c12_i32 : i32 to vector<8x13xi32>
    %433 = arith.cmpi eq, %157, %432 : vector<8x13xi32>
    %434 = vector.shape_cast %425 : vector<8x1xf32> to vector<8x1xf32>
    %435 = vector.broadcast %434 : vector<8x1xf32> to vector<8x13xf32>
    %436 = arith.select %433, %435, %414 : vector<8x13xi1>, vector<8x13xf32>
    %c12_i32_92 = arith.constant 12 : i32
    %437 = vector.broadcast %c12_i32_92 : i32 to vector<8x13xi32>
    %438 = arith.cmpi eq, %157, %437 : vector<8x13xi32>
    %439 = vector.shape_cast %431 : vector<8x1xi32> to vector<8x1xi32>
    %440 = vector.broadcast %439 : vector<8x1xi32> to vector<8x13xi32>
    %441 = arith.select %438, %440, %419 : vector<8x13xi1>, vector<8x13xi32>
    %c0_93 = arith.constant 0 : index
    %c0_94 = arith.constant 0 : index
    %c0_95 = arith.constant 0 : index
    %c0_96 = arith.constant 0 : index
    %442 = vector.load %arg7[%c0_93, %c0_94, %c0_95, %c0_96] : memref<1x1x8x13xf32, #tpu.memory_space<vmem>>, vector<1x1x8x13xf32>
    %443 = vector.shape_cast %442 : vector<1x1x8x13xf32> to vector<8x13xf32>
    %444 = vector.shape_cast %436 : vector<8x13xf32> to vector<1x1x8x13xf32>
    tpu.vector_store %arg7[%c0_93, %c0_94, %c0_95, %c0_96], %444 {strides = array<i32>} : memref<1x1x8x13xf32, #tpu.memory_space<vmem>>, vector<1x1x8x13xf32>,
    %c0_97 = arith.constant 0 : index
    %c0_98 = arith.constant 0 : index
    %c0_99 = arith.constant 0 : index
    %c0_100 = arith.constant 0 : index
    %445 = vector.load %arg8[%c0_97, %c0_98, %c0_99, %c0_100] : memref<1x1x8x13xi32, #tpu.memory_space<vmem>>, vector<1x1x8x13xi32>
    %446 = vector.shape_cast %445 : vector<1x1x8x13xi32> to vector<8x13xi32>
    %447 = vector.shape_cast %441 : vector<8x13xi32> to vector<1x1x8x13xi32>
    tpu.vector_store %arg8[%c0_97, %c0_98, %c0_99, %c0_100], %447 {strides = array<i32>} : memref<1x1x8x13xi32, #tpu.memory_space<vmem>>, vector<1x1x8x13xi32>,
    return
  }
  func.func @transform_0(%arg0: i32, %arg1: i32) -> (i32, i32, i32) {
    %c0_i32 = arith.constant 0 : i32
    %c0_i32_0 = arith.constant 0 : i32
    return %arg0, %arg1, %c0_i32 : i32, i32, i32
  }
  func.func @transform_1(%arg0: i32, %arg1: i32) -> (i32, i32, i32) {
    %c0_i32 = arith.constant 0 : i32
    %c0_i32_0 = arith.constant 0 : i32
    return %arg0, %c0_i32, %arg1 : i32, i32, i32
  }
  func.func @transform_2(%arg0: i32, %arg1: i32) -> (i32, i32, i32) {
    %c0_i32 = arith.constant 0 : i32
    %c0_i32_0 = arith.constant 0 : i32
    %c0_i32_1 = arith.constant 0 : i32
    return %arg0, %c0_i32, %c0_i32_0 : i32, i32, i32
  }
  func.func @transform_3(%arg0: i32, %arg1: i32) -> (i32, i32, i32) {
    %c0_i32 = arith.constant 0 : i32
    %c0_i32_0 = arith.constant 0 : i32
    return %arg0, %c0_i32, %arg1 : i32, i32, i32
  }
  func.func @transform_4(%arg0: i32, %arg1: i32) -> (i32, i32, i32) {
    %c0_i32 = arith.constant 0 : i32
    %c0_i32_0 = arith.constant 0 : i32
    return %arg0, %c0_i32, %arg1 : i32, i32, i32
  }
  func.func @transform_5(%arg0: i32, %arg1: i32) -> (i32, i32, i32, i32) {
    %c0_i32 = arith.constant 0 : i32
    %c0_i32_0 = arith.constant 0 : i32
    %c0_i32_1 = arith.constant 0 : i32
    return %arg0, %arg1, %c0_i32, %c0_i32_0 : i32, i32, i32, i32
  }
  func.func @transform_6(%arg0: i32, %arg1: i32) -> (i32, i32, i32, i32) {
    %c0_i32 = arith.constant 0 : i32
    %c0_i32_0 = arith.constant 0 : i32
    %c0_i32_1 = arith.constant 0 : i32
    return %arg0, %arg1, %c0_i32, %c0_i32_0 : i32, i32, i32, i32
  }
}

</mosaic_0001>

<bundles_post_ra>
// kernel: tpu_custom_call.1
= control target key start
LH: loop header
LB: loop body
LE: loop exit
PB: predicated region body
PF: predicated region fallthrough
CT: control target
= control target key end

     0   :  { %s2842_s0 = inlined_call_operand.hbm [shape: bf16[2,256,20], index: 0, kind: input, shape index: {}]   ;;  %s2843_s1 = inlined_call_operand.hbm [shape: f32[2,8,256], index: 1, kind: input, shape index: {}]   ;;  %s2844_s2 = inlined_call_operand.hbm [shape: f32[2,8,8], index: 2, kind: input, shape index: {}]   ;;  %s2845_s3 = inlined_call_operand.hbm [shape: f32[2,8,256], index: 3, kind: output, shape index: {0}]   ;;  %s2846_s4 = inlined_call_operand.hbm [shape: f32[2,8,256], index: 4, kind: output, shape index: {1}]   ;;  %s2847_s5 = inlined_call_operand.hbm [shape: f32[2,1,8,13], index: 5, kind: output, shape index: {2}]   ;;  %s2848_s6 = inlined_call_operand.hbm [shape: s32[2,1,8,13], index: 6, kind: output, shape index: {3}]  }
   0x1   :  { %2858 = sst [smem:[#allocation23_spill]] %s2842_s0 }
   0x2   :  { %2859 = sst [smem:[#allocation24_spill]] %s2843_s1 }
   0x3   :  { %12 = vsyncpa [#allocation3], 0 }
   0x4   :  { %14 = vsyncpa [#allocation3 + $0x1], 0 }
   0x5   :  { %15 = vsyncpa [#allocation6], 0 }
   0x6   :  { %17 = vsyncpa [#allocation6 + $0x1], 0 }
   0x7   :  { %18 = vsyncpa [#allocation4], 0 }
   0x8   :  { %20 = vsyncpa [#allocation4 + $0x1], 0 }
   0x9   :  { %21 = vsyncpa [#allocation10], 0 }
   0xa   :  { %23 = vsyncpa [#allocation10 + $0x1], 0 }
   0xb   :  { %24 = vsyncpa [#allocation13], 0 }
   0xc   :  { %26 = vsyncpa [#allocation13 + $0x1], 0  ;;  %s2131_s21 = smov 0   ;;  %s2133_s22 = smov 0  }
   0xd   :  { %s2135_s23 = smov 0   ;;  %s2137_s24 = smov 0  }
   0xe   :  { %s2139_s25 = smov 0   ;;  %s2141_s26 = smov 0  }
   0xf LB: > { %2860 = sst [smem:[#allocation19_spill]] %s2063_s23  ;;  %s2162_s27 = sadd.s32 4294967295, %s2075_s26   ;;  %s2075_s26 = sphi %s2141_s26, %s32_s26   ;;  %s2071_s25 = sphi %s2139_s25, %s2892_s25   ;;  %s2067_s24 = sphi %s2137_s24, %s2891_s24   ;;  %s2063_s23 = sphi %s2135_s23, %s2887_s23   ;;  %s2059_s22 = sphi %s2133_s22, %s2890_s22   ;;  %s2055_s21 = sphi %s2131_s21, %s2889_s21  }
  0x10   : > { %2861 = sst [smem:[#allocation20_spill]] %s2075_s26  ;;  %s2849_s28 = sadd.s32 4294967294, %s2075_s26  }
  0x11   : > { %s44_s29 = sadd.s32 1, %s2071_s25  ;;  %s53_s30 = sadd.s32 1, %s2063_s23 }
  0x12   : > { %p46_p0 = scmp.ge.s32.totalorder %s44_s29, 2  ;;  %p60_p1 = scmp.ne.s32.totalorder %s2063_s23, %s2059_s22 }
  0x13   : > { %p61_p2 = scmp.eq.s32.totalorder %s2075_s26, 0  ;;  %p66_p3 = scmp.ne.s32.totalorder %s2059_s22, %s2055_s21 }
  0x14   : > { %s2894_s29 = smov (%p46_p0, %s44_s29), 0  ;;  %p67_p5 = scmp.eq.s32.totalorder %s2162_s27, 0 }
  0x15   : > { %2862 = sst [smem:[#allocation21_spill]] %s2894_s29  ;;  %p2174_p4 = por %p61_p2, %p60_p1 }
  0x16   : > { %s48_s8 = ssub.s32 %s2071_s25, %s2894_s29  ;;  %p146_p6 = scmp.eq.s32.totalorder %s2162_s27, 1 }
  0x17   : > { %p51_p7 = scmp.eq.s32.totalorder %s48_s8, 0  ;;  %p2182_p8 = por %p67_p5, %p66_p3 }
  0x18   : > { %p2186_p9 = por %p146_p6, %p60_p1  ;;  %p152_p10 = scmp.eq.s32.totalorder %s2849_s28, 1 }
  0x19   : > { %s2864_s9 = scalar_select %p2182_p8, 1, 0 }
  0x1a   : > { %s2865_s10 = scalar_select %p2186_p9, 1, 0 }
  0x1b   : > { %s2193_s11 = scalar_select %p51_p7, %s2063_s23, %s53_s30  }
  0x1c   : > { %p2195_p11 = por %p152_p10, %p66_p3  ;;  %p1708_p13 = scmp.lt.s32.totalorder %s2075_s26, 2 }
  0x1d   : > { %2866 = sst [smem:[#allocation22_spill]] %s2193_s11  ;;  %s2202_s13 = sand.u32 1, %s2063_s23  }
  0x1e   : > { %s2867_s12 = scalar_select %p2195_p11, 1, 0 }
  0x1f   : > { %s279_s14 = sand.u32 1, %s2075_s26   ;;  %s1596_s15 = sshll.u32 %s2202_s13, 4 }
  0x20   : > { %p2208_p0 = pnand %p1708_p13, %p2174_p4  ;;  %s1640_s17 = sshll.u32 %s2071_s25, 8 }
  0x21   : > { %s2869_s1 = sld [smem:[#allocation24_spill]]  ;;  %s283_s30 = scalar_lea.vmem [#allocation5], %s1596_s15 }
  0x22   : > { %s2868_s16 = scalar_select %p2208_p0, 1, 0 }
  0x23   : > { %s293_s8 = sshll.u32 %s283_s30, 4  ;;  %s2222_s7 = scalar_lea.sflag [#allocation6], %s279_s14  ;;  %s2219_s8 = int_to_ptr.vmem [resolvable:$true] %s293_s8 }
  0x24   : > { %p2228_p4 = pneg %p2208_p0 }
  0x27   : > { %s2216_s20 = scalar_lea.hbm %s2869_s1, %s1640_s17  ;;  %s1812_s18 = scalar_lea.hbm %s2869_s1, 512 }
  0x28   : > { %s1807_s28 = scalar_lea.hbm %s2216_s20, 256  ;;  %p1813_p7 = scmp.lt.u32.totalorder %s2216_s20, %s2869_s1 }
  0x29   : > { %p1808_p3 = scmp.ne.s32.totalorder %s2216_s20, %s1807_s28  ;;  %p1814_p10 = scmp.lt.u32.totalorder %s1812_s18, %s1807_s28 }
  0x2a   : > { %p1816_p12 = scmp.lt.u32.totalorder %s1807_s28, %s2216_s20 }
  0x2b   : > { %p1810_p5 = pnand %p2228_p4, %p1808_p3  ;;  %p1815_p13 = por %p1814_p10, %p1813_p7 }
  0x2d   : > { %p1811_p6 = pneg %p1810_p5  ;;  %p1817_p1 = por %p1816_p12, %p1815_p13 }
  0x2f   : > { %p1818_p2 = pnand %p1817_p1, %p1811_p6 }
  0x31   : > { %1821 = shalt.err (!%p1818_p2)
}
  0x32   : > { %s1822_s14 = scalar_lea.vmem %s2219_s8, 256  ;;  %s2077_s17 = smov [#allocation5]  }
  0x33   : > { %p1823_p3 = scmp.ne.s32.totalorder %s2219_s8, %s1822_s14  ;;  %s1827_s15 = sshll.u32 %s2077_s17, 4  ;;  %s1828_s15 = int_to_ptr.vmem [resolvable:$false] %s1827_s15 }
  0x34   : > { %s1829_s19 = scalar_lea.vmem %s1828_s15, 512  ;;  %p1830_p9 = scmp.lt.s32.totalorder %s2219_s8, %s1828_s15 }
  0x35   : > { %p1825_p5 = pnand %p1823_p3, %p2228_p4  ;;  %p1831_p8 = scmp.lt.s32.totalorder %s1829_s19, %s1822_s14 }
  0x37   : > { %p1826_p11 = pneg %p1825_p5  ;;  %p1832_p7 = por %p1831_p8, %p1830_p9 }
  0x39   : > { %p1833_p10 = pnand %p1832_p7, %p1826_p11 }
  0x3b   : > { %1836 = shalt.err (!%p1833_p10)
}
  0x3c   : > { %1691 = dma.hbm_to_vmem [thread:$0]  (!%p2208_p0), %s2216_s20, 256, %s2219_s8, %s2222_s7  }
  0x3d   : > { %p2871_p12 = scmp.lt.s32.totalorder %s2075_s26, 3  ;;  %p2872_p1 = scmp.ge.s32.totalorder %s2075_s26, 1 }
  0x3e   : > { %s1593_s18 = sshll.u32 %s2202_s13, 7  ;;  %s1639_s30 = sshll.u32 %s2071_s25, 11 }
  0x3f   : > { %p2256_p2 = pnand %p2872_p1, %p2871_p12  ;;  %s2874_s0 = sld [smem:[#allocation23_spill]] }
  0x40   : > { %s260_s19 = scalar_lea.vmem [#allocation2], %s1593_s18  ;;  %s257_s20 = scalar_lea.sflag [#allocation3], %s2202_s13 }
  0x41   : > { %s2873_s28 = scalar_select %p2256_p2, 1, 0 }
  0x42   : > { %s269_s1 = sshll.u32 %s260_s19, 4  ;;  %s2267_s1 = int_to_ptr.vmem [resolvable:$true] %s269_s1 }
  0x45   : > { %s2265_s15 = scalar_lea.hbm %s2874_s0, %s1639_s30  ;;  %s1842_s14 = scalar_lea.hbm %s2874_s0, 4096 }
  0x46   : > { %s1837_s8 = scalar_lea.hbm %s2265_s15, 2048  ;;  %p1843_p6 = scmp.lt.u32.totalorder %s2265_s15, %s2874_s0 }
  0x47   : > { %p1838_p8 = scmp.ne.s32.totalorder %s2265_s15, %s1837_s8  ;;  %p1844_p13 = scmp.lt.u32.totalorder %s1842_s14, %s1837_s8 }
  0x48   : > { %p1846_p5 = scmp.lt.u32.totalorder %s1837_s8, %s2265_s15 }
  0x49   : > { %p1840_p9 = pnand %p1838_p8, %p2228_p4  ;;  %p1845_p3 = por %p1844_p13, %p1843_p6 }
  0x4b   : > { %p1841_p11 = pneg %p1840_p9  ;;  %p1847_p7 = por %p1846_p5, %p1845_p3 }
  0x4d   : > { %p1848_p10 = pnand %p1847_p7, %p1841_p11 }
  0x4f   : > { %1851 = shalt.err (!%p1848_p10)
}
  0x50   : > { %s1852_s18 = scalar_lea.vmem %s2267_s1, 2048  ;;  %s2078_s23 = smov [#allocation2]  }
  0x51   : > { %p1853_p12 = scmp.ne.s32.totalorder %s2267_s1, %s1852_s18  ;;  %s1857_s11 = sshll.u32 %s2078_s23, 4  ;;  %s1858_s11 = int_to_ptr.vmem [resolvable:$false] %s1857_s11 }
  0x52   : > { %s1859_s19 = scalar_lea.vmem %s1858_s11, 4096  ;;  %p1860_p9 = scmp.lt.s32.totalorder %s2267_s1, %s1858_s11 }
  0x53   : > { %p1855_p1 = pnand %p1853_p12, %p2228_p4  ;;  %p1861_p2 = scmp.lt.s32.totalorder %s1859_s19, %s1852_s18 }
  0x55   : > { %p1856_p8 = pneg %p1855_p1  ;;  %p1862_p6 = por %p1861_p2, %p1860_p9 }
  0x57   : > { %p1863_p13 = pnand %p1862_p6, %p1856_p8 }
  0x59   : > { %1866 = shalt.err (!%p1863_p13)
}
  0x5a   : > { %s2079_s8 = smov 64   ;;  %s2080_s14 = smov 4  }
  0x5b   : > { %1688 = dma.hbm_to_vmem [thread:$0]  (!%p2208_p0), %s2265_s15, 2048, %s2267_s1, %s257_s20, %s2079_s8, %s2079_s8, %s2080_s14  }
  0x5c   : > { %s1599_s30 = sshll.u32 %s2202_s13, 3  ;;  %s1600_s17 = sshll.u32 %s2071_s25, 7 }
  0x5d   : > { %s2298_s18 = scalar_lea.hbm %s2844_s2, %s1600_s17  ;;  %s304_s19 = scalar_lea.vmem [#allocation7], %s1599_s30 }
  0x5e   : > { %s311_s0 = sshll.u32 %s304_s19, 4  ;;  %s1867_s26 = scalar_lea.hbm %s2298_s18, 128  ;;  %s312_s0 = int_to_ptr.vmem [resolvable:$true] %s311_s0 }
  0x5f   : > { %p1868_p2 = scmp.ne.s32.totalorder %s2298_s18, %s1867_s26  ;;  %s1872_s15 = scalar_lea.hbm %s2844_s2, 256 }
  0x60   : > { %p1873_p5 = scmp.lt.u32.totalorder %s2298_s18, %s2844_s2  ;;  %p1874_p7 = scmp.lt.u32.totalorder %s1872_s15, %s1867_s26 }
  0x61   : > { %p1870_p11 = pnand %p1868_p2, %p2228_p4  ;;  %p1876_p12 = scmp.lt.u32.totalorder %s1867_s26, %s2298_s18 }
  0x62   : > { %p1875_p10 = por %p1874_p7, %p1873_p5 }
  0x63   : > { %p1871_p3 = pneg %p1870_p11 }
  0x64   : > { %p1877_p1 = por %p1876_p12, %p1875_p10 }
  0x66   : > { %p1878_p8 = pnand %p1877_p1, %p1871_p3 }
  0x68   : > { %1881 = shalt.err (!%p1878_p8)
}
  0x69   : > { %s1882_s14 = scalar_lea.vmem %s312_s0, 128  ;;  %s2081_s30 = smov [#allocation7]  }
  0x6a   : > { %p1883_p9 = scmp.ne.s32.totalorder %s312_s0, %s1882_s14  ;;  %s1887_s17 = sshll.u32 %s2081_s30, 4  ;;  %s1888_s17 = int_to_ptr.vmem [resolvable:$false] %s1887_s17 }
  0x6b   : > { %s1889_s23 = scalar_lea.vmem %s1888_s17, 256  ;;  %p1890_p2 = scmp.lt.s32.totalorder %s312_s0, %s1888_s17 }
  0x6c   : > { %p1885_p6 = pnand %p1883_p9, %p2228_p4  ;;  %p1891_p11 = scmp.lt.s32.totalorder %s1889_s23, %s1882_s14 }
  0x6e   : > { %p1886_p13 = pneg %p1885_p6  ;;  %p1892_p0 = por %p1891_p11, %p1890_p2 }
  0x70   : > { %p1893_p5 = pnand %p1892_p0, %p1886_p13 }
  0x72   : > { %1896 = shalt.err (!%p1893_p5)
}
  0x73   : > { %p2875_p7 = scmp.ne.s32.totalorder %s2868_s16, 0  ;;  %p2876_p3 = scmp.ne.s32.totalorder %s2873_s28, 0 }
  0x74   : > { %s2321_s26 = sand.u32 (!%p2876_p3), 1, %s2059_s22   ;;  %p2877_p0 = scmp.ne.s32.totalorder (!%p2876_p3), %s2864_s9, 0 }
  0x75   : > { %1694 = dma.hbm_to_vmem [thread:$0]  (!%p2875_p7), %s2298_s18, 128, %s312_s0, %s2222_s7  }
  0x76   : > { %320 = sbr.rel (%p2876_p3) target bundleno = 6356 (0x18d4), region = 32  ;;  %s1602_s29 = sshll.u32 (!%p2876_p3), %s2321_s26, 7 }
  0x77   : > { %s323_s11 = scalar_lea.sflag (!%p2876_p3), [#allocation3], %s2321_s26  ;;  %s2325_s19 = scalar_lea.vmem (!%p2876_p3), [#allocation2], %s1602_s29 }
  0x7d   : > { %2034 = dma.done.wait (%p2877_p0), %s323_s11, 2048  }
  0x7e   : > { %2036 = vsyncadd (%p2877_p0), %s323_s11, 4294965248  ;;  %s331_s0 = sand.u32 1, %s2162_s27   ;;  %s2333_s16 = sshll.u32 %s2321_s26, 4 }
  0x7f   : > { %s332_s7 = scalar_lea.sflag [#allocation6], %s331_s0  ;;  %s335_s28 = scalar_lea.vmem [#allocation5], %s2333_s16 }
  0x80   : > { %2038 = dma.done.wait (%p2877_p0), %s332_s7, 384  }
  0x81   : > { %2040 = vsyncadd (%p2877_p0), %s332_s7, 4294966912  ;;  %v2082_v0 = vmov 4   ;;  %s2343_s18 = sshll.u32 %s2321_s26, 3  ;;  %vm585_vm0 = vcmask 162816   ;;  %v1779_v3 = vld [vmem:[%s2325_s19 + $0x40] sm:$0xff]   ;;  %v1781_v6 = vld [vmem:[%s2325_s19 + $0x48] sm:$0xff]   ;;  %v439_v31 = vlaneseq }
  0x82   : > { %1770 = vset.pattern.permute.xlu0 %v2082_v0  ;;  %s344_s1 = scalar_lea.vmem [#allocation7], %s2343_s18  ;;  %v1780_v4 = vld [vmem:[%s2325_s19] sm:$0xff]   ;;  %1661 = vmatprep.subr.msk.bf16.mxu0 %vm585_vm0, %v1779_v3  ;;  %v1782_v8 = vld [vmem:[%s2325_s19 + $0x8] sm:$0xff]   ;;  %s2083_s9 = smov 2   ;;  %v1783_v10 = vld [vmem:[%s2325_s19 + $0x50] sm:$0xff]   ;;  %v2084_v12 = vmov 0  }
  0x83   : > { %v2346_v1 = vld [vmem:[%s344_s1] sm:$0xff]  ;;  %v590_v7 = vsel %vm585_vm0, %v1780_v4, 0  ;;  %v593_v9 = vsel %vm585_vm0, %v1782_v8, 0  ;;  %v1784_v11 = vld [vmem:[%s2325_s19 + $0x10] sm:$0xff]   ;;  %1771 = vset.pattern.permute.xlu1 %v2084_v12  ;;  %v1785_v14 = vld [vmem:[%s2325_s19 + $0x58] sm:$0xff]   ;;  %v2085_v18 = vmov 1  }
  0x84   : > { %v1669_v2 = vtrunc.f32 %v2346_v1  ;;  %1644 = vmatpush3.bf16.xpose.msra.mxu0 %v590_v7  ;;  %v596_v13 = vsel %vm585_vm0, %v1784_v11, 0  ;;  %v1786_v15 = vld [vmem:[%s2325_s19 + $0x18] sm:$0xff]   ;;  %v1787_v17 = vld [vmem:[%s2325_s19 + $0x60] sm:$0xff]   ;;  %v2086_v20 = vmov 2   ;;  %v1789_v22 = vld [vmem:[%s2325_s19 + $0x68] sm:$0xff]   ;;  %v2383_v32 = vand.u32 127, %v439_v31 }
  0x85   : > { %1662 = vmatprep.subr.msk.bf16.mxu0 %vm585_vm0, %v1781_v6  ;;  %v599_v16 = vsel %vm585_vm0, %v1786_v15, 0  ;;  %v1788_v19 = vld [vmem:[%s2325_s19 + $0x20] sm:$0xff]   ;;  %v1790_v23 = vld [vmem:[%s2325_s19 + $0x28] sm:$0xff]   ;;  %v1791_v25 = vld [vmem:[%s2325_s19 + $0x70] sm:$0xff]   ;;  %v2087_v34 = vmov 0.0   ;;  %s2088_s13 = smov 127  }
  0x86   : > { %v1670_v5 = vcvt.f32.s32 %v1669_v2  ;;  %v602_v21 = vsel %vm585_vm0, %v1788_v19, 0  ;;  %v605_v24 = vsel %vm585_vm0, %v1790_v23, 0  ;;  %v1792_v26 = vld [vmem:[%s2325_s19 + $0x30] sm:$0xff]   ;;  %v1793_v28 = vld [vmem:[%s2325_s19 + $0x78] sm:$0xff]   ;;  %v2089_v40 = vmov 3   ;;  %s2496_s15 = scalar_lea.vmem [#allocation9], %s2333_s16 }
  0x87   : > { %v608_v27 = vsel %vm585_vm0, %v1792_v26, 0  ;;  %v1794_v29 = vld [vmem:[%s2325_s19 + $0x38] sm:$0xff]   ;;  %vm488_vm2 = vcmp.gt.f32.partialorder %v2346_v1, 0.0  ;;  %v2090_v41 = vmov 6   ;;  %v2091_v43 = vmov 5   ;;  %v2400_v50 = vld [vmem:[%s335_s28] sm:$0xff] }
  0x88   : > { %499 = vperm.xlu0 %1770, %v1670_v5   ;;  %v611_v30 = vsel %vm585_vm0, %v1794_v29, 0  ;;  %v489_v42 = vsel %vm488_vm2, 1, %v2084_v12  ;;  %v2404_v51 = vld [vmem:[%s335_s28 + $0x8] sm:$0xff]  ;;  %v687_v53 = vrot.slane %v2400_v50, 6  ;;  %v2410_v55 = vshrl.u32 %v439_v31, 7  ;;  %s2505_s20 = scalar_lea.vmem [#allocation8], %s2333_s16 }
  0x89   : > { %v688_v54 = vrot.slane %v2404_v51, 6  ;;  %vm919_vm2 = vcmp.eq.s32.totalorder %v2383_v32, 0  ;;  %s390_s8 = scalar_lea.vmem [#allocation11], %s2343_s18  ;;  %s1641_s14 = sshll.u32 %s2067_s24, 8 }
  0x8a   : > { %v691_v56 = vsub.f32 %v2400_v50, %v687_v53  ;;  %v2415_v58 = vsub.s32 1, %v2410_v55  ;;  %v2418_v59 = vsub.s32 0, %v2410_v55  ;;  %v697_v61 = vsub.s32 2, %v2410_v55  ;;  %s1333_s30 = sshll.u32 %s2496_s15, 4  ;;  %s2696_s29 = scalar_lea.hbm %s2846_s4, %s1641_s14  ;;  %s1334_s30 = int_to_ptr.vmem [resolvable:$true] %s1333_s30 }
  0x8b   : > { %v692_v57 = vsub.f32 %v2404_v51, %v688_v54  ;;  %v721_v62 = vsub.s32 3, %v2410_v55  ;;  %s2700_s11 = scalar_lea.sflag [#allocation10], %s331_s0  ;;  %s1897_s19 = scalar_lea.vmem %s1334_s30, 256 }
  0x8c   : > { %680 = vrot.lane.b32.xlu0 %v2346_v1, %s2083_s9  ;;  %1646 = vmatpush3.bf16.xpose.msra.mxu0 %v593_v9  ;;  %v693_v63 = vadd.f32 1e-07, %v691_v56  ;;  %v736_v2 = vrot.slane %v2404_v51, %v2415_v58  ;;  %v698_v4 = vrot.slane %v2400_v50, %v697_v61  ;;  %v702_v5 = vrot.slane %v2404_v51, %v697_v61  ;;  %p1898_p4 = scmp.ne.s32.totalorder %s1334_s30, %s1897_s19  ;;  %p2881_p10 = scmp.ne.s32.totalorder %s2865_s10, 0 }
  0x8d   : > { %1663 = vmatprep.subr.msk.bf16.mxu0 %vm585_vm0, %v1783_v10  ;;  %1772 = vset.pattern.permute.xlu0 %v2085_v18  ;;  %v694_v0 = vadd.f32 1e-07, %v692_v57  ;;  %v708_v6 = vrot.slane %v2400_v50, %v2418_v59  ;;  %v712_v7 = vrot.slane %v2404_v51, %v2418_v59  ;;  %v722_v8 = vrot.slane %v2400_v50, %v721_v62  ;;  %s2092_s16 = smov [#allocation9]  }
  0x8e   : > { %v726_v9 = vrot.slane %v2404_v51, %v721_v62  ;;  %v752_v15 = vrot.slane %v693_v63, 1  ;;  %p1899_p12 = pnand %p1898_p4, %p2881_p10  ;;  %s1901_s7 = sshll.u32 %s2092_s16, 4  ;;  %s1902_s7 = int_to_ptr.vmem [resolvable:$false] %s1901_s7 }
  0x8f   : > { %s1903_s28 = scalar_lea.vmem %s1902_s7, 512  ;;  %p1904_p8 = scmp.lt.s32.totalorder %s1334_s30, %s1902_s7 }
  0x90   : > { %463 = vperm.xlu0 %1772, %v2346_v1   ;;  %p1900_p1 = pneg %p1899_p12  ;;  %p1905_p9 = scmp.lt.s32.totalorder %s1903_s28, %s1897_s19 }
  0x92   : > { %p1906_p6 = por %p1905_p9, %p1904_p8 }
  0x94   : > { %1648 = vmatpush3.bf16.xpose.msra.mxu0 %v596_v13  ;;  %1775 = vset.pattern.permute.xlu0 %v2086_v20  ;;  %p1907_p13 = pnand %p1906_p6, %p1900_p1 }
  0x95   : > { %1664 = vmatprep.subr.msk.bf16.mxu0 %vm585_vm0, %v1785_v14 }
  0x9c   : > { %1650 = vmatpush3.bf16.xpose.msra.mxu0 %v599_v16  ;;  %v753_v16 = vrot.slane %v694_v0, 1  ;;  %v802_v0 = vrot.slane %v2404_v51, 2 }
  0x9d   : > { %1665 = vmatprep.subr.msk.bf16.mxu0 %vm585_vm0, %v1787_v17 }
  0xa4   : > { %1652 = vmatpush3.bf16.xpose.msra.mxu0 %v602_v21  ;;  %v756_v21 = vmul.f32 %v752_v15, %v691_v56 }
  0xa5   : > { %1666 = vmatprep.subr.msk.bf16.mxu0 %vm585_vm0, %v1789_v22  ;;  %v757_v22 = vmul.f32 %v753_v16, %v692_v57  ;;  %v801_v57 = vrot.slane %v2400_v50, 2 }
  0xac   : > { %1654 = vmatpush3.bf16.xpose.msra.mxu0 %v605_v24 }
  0xad   : > { %1667 = vmatprep.subr.msk.bf16.mxu0 %vm585_vm0, %v1791_v25 }
  0xb4   : > { %1656 = vmatpush3.bf16.xpose.msra.mxu0 %v608_v27  ;;  %v766_v27 = vrot.slane %v756_v21, %v697_v61 }
  0xb5   : > { %1668 = vmatprep.subr.msk.bf16.mxu0 %vm585_vm0, %v1793_v28  ;;  %v770_v28 = vrot.slane %v757_v22, %v697_v61 }
  0xbc   : > { %1658 = vmatpush3.bf16.xpose.msra.mxu0 %v611_v30 }
 0x107   : > { %v500_v33 = vpop.permute.xlu0 %499 }
 0x108   : > { %vm501_vm1 = vcmp.eq.s32.totalorder %v2383_v32, %v500_v33 }
 0x109   : > { %v1609_v35 = vsel %vm501_vm1, 1.0, %v2087_v34  ;;  %v841_v34 = vsub.s32 4, %v2410_v55 }
 0x10a   : > { %v504_v36 = vpack.c.bf16 %v1609_v35, %v1609_v35 }
 0x10b   : > { %v681_v37 = vpop.permute.xlu0 %680  ;;  %v842_v56 = vrot.slane %v2400_v50, %v841_v34  ;;  %v846_v61 = vrot.slane %v2404_v51, %v841_v34 }
 0x10c   : > { %v683_v38 = vsub.f32 %v2346_v1, %v681_v37  ;;  %1659 = vmatprep.mubr.msk.bf16.mxu0 %vm585_vm0, %v504_v36 }
 0x10d   : > { %1660 = vmatmul.mubr.msk.bf16.vlgmr.msra.gmra.mrb[0].mxu0 %vm585_vm0, %v504_v36 }
 0x10e   : > { %v684_v39 = vadd.f32 1e-07, %v683_v38 }
 0x10f   : > { %v2428_v3 = vpop.permute.xlu0 %463 }
 0x110   : > { %746 = vrot.lane.b32.xlu1 %v684_v39, %s2088_s13  ;;  %v738_v11 = vmax.f32 %v2428_v3, %v736_v2  ;;  %v790_v37 = vmin.f32 %v2428_v3, %v736_v2 }
 0x114   : > { %449 = vperm.xlu1 %1771, %v2346_v1  }
 0x118   : > { %1773 = vset.pattern.permute.xlu1 %v2086_v20 }
 0x119   : > { %471 = vperm.xlu1 %1773, %v2346_v1  }
 0x11d   : > { %1774 = vset.pattern.permute.xlu1 %v2089_v40 }
 0x11e   : > { %477 = vperm.xlu1 %1774, %v2346_v1  }
 0x122   : > { %1776 = vset.pattern.permute.xlu1 %v2090_v41 }
 0x123   : > { %848 = vperm.xlu1 %1776, %v2346_v1   ;;  %v732_v1 = vrot.slane %v2400_v50, %v2415_v58 }
 0x125   : > { %v737_v10 = vmax.f32 %v2428_v3, %v732_v1  ;;  %v789_v36 = vmin.f32 %v2428_v3, %v732_v1 }
 0x127   : > { %1777 = vset.pattern.permute.xlu1 %v2091_v43 }
 0x128   : > { %491 = vperm.xlu1 %1777, %v489_v42  }
 0x182   : > { %v747_v44 = vpop.permute.xlu1 %746 }
 0x183   : > { %v749_v45 = vmul.f32 %v747_v44, %v683_v38 }
 0x185   : > { %760 = vperm.xlu0 %1775, %v749_v45  }
 0x189   : > { %1778 = vset.pattern.permute.xlu0 %v2090_v41 }
 0x193   : > { %v2406_v52 = vpop.permute.xlu1 %449 }
 0x194   : > { %v713_v13 = vmax.f32 %v2406_v52, %v708_v6  ;;  %v714_v14 = vmax.f32 %v2406_v52, %v712_v7  ;;  %v783_v43 = vmin.f32 %v2406_v52, %v708_v6  ;;  %v784_v44 = vmin.f32 %v2406_v52, %v712_v7 }
 0x198   : > { %v2420_v60 = vpop.permute.xlu1 %471 }
 0x199   : > { %v703_v17 = vmin.f32 %v2420_v60, %v698_v4  ;;  %v704_v18 = vmin.f32 %v2420_v60, %v702_v5  ;;  %v781_v42 = vmax.f32 %v2420_v60, %v698_v4  ;;  %v782_v53 = vmax.f32 %v2420_v60, %v702_v5 }
 0x19a   : > { %v805_v5 = vadd.f32 %v801_v57, %v2400_v50 }
 0x19b   : > { %v715_v23 = vsub.f32 %v703_v17, %v713_v13  ;;  %v716_v24 = vsub.f32 %v704_v18, %v714_v14  ;;  %v785_v1 = vsub.f32 %v781_v42, %v783_v43  ;;  %v786_v6 = vsub.f32 %v782_v53, %v784_v44 }
 0x19c   : > { %v810_v17 = vrot.slane %v805_v5, %v2418_v59  ;;  %v824_v18 = vrot.slane %v805_v5, %v2415_v58 }
 0x19d   : > { %v2440_v12 = vpop.permute.xlu1 %477  ;;  %v717_v29 = vmax.f32 %v715_v23, 0.0  ;;  %v718_v30 = vmax.f32 %v716_v24, 0.0  ;;  %v794_v14 = vmul.f32 %v786_v6, %v786_v6 }
 0x19e   : > { %v727_v19 = vmin.f32 %v2440_v12, %v722_v8  ;;  %v728_v20 = vmin.f32 %v2440_v12, %v726_v9  ;;  %v787_v45 = vmax.f32 %v2440_v12, %v722_v8  ;;  %v788_v54 = vmax.f32 %v2440_v12, %v726_v9 }
 0x1a0   : > { %v739_v25 = vsub.f32 %v727_v19, %v737_v10  ;;  %v740_v26 = vsub.f32 %v728_v20, %v738_v11  ;;  %v791_v2 = vsub.f32 %v787_v45, %v789_v36  ;;  %v792_v7 = vsub.f32 %v788_v54, %v790_v37 }
 0x1a1   : > { %v806_v10 = vadd.f32 %v802_v0, %v2404_v51  ;;  %v793_v11 = vmul.f32 %v785_v1, %v785_v1  ;;  %v441_v37 = vsub.s32 5, %v2410_v55 }
 0x1a2   : > { %v741_v31 = vmax.f32 %v739_v25, 0.0  ;;  %v742_v33 = vmax.f32 %v740_v26, 0.0  ;;  %v849_v4 = vpop.permute.xlu1 %848  ;;  %v795_v13 = vmul.f32 %v791_v2, %v791_v2  ;;  %v796_v15 = vmul.f32 %v792_v7, %v792_v7 }
 0x1a3   : > { %v851_v8 = vsub.f32 %v842_v56, %v849_v4  ;;  %v852_v9 = vsub.f32 %v846_v61, %v849_v4  ;;  %v814_v20 = vrot.slane %v806_v10, %v2418_v59  ;;  %v828_v21 = vrot.slane %v806_v10, %v2415_v58 }
 0x1a4   : > { %v743_v38 = vmul.f32 %v741_v31, %v717_v29  ;;  %v744_v39 = vmul.f32 %v742_v33, %v718_v30  ;;  %v797_v22 = vadd.f32 %v795_v13, %v793_v11  ;;  %v798_v23 = vadd.f32 %v796_v15, %v794_v14 }
 0x1a5   : > { %v853_v16 = vmul.f32 %v851_v8, %v851_v8  ;;  %v854_v19 = vmul.f32 %v852_v9, %v852_v9  ;;  %v815_v26 = vsub.f32 %v810_v17, %v2406_v52  ;;  %v816_v30 = vsub.f32 %v814_v20, %v2406_v52 }
 0x1a6   : > { %v830_v31 = vsub.f32 %v828_v21, %v2428_v3  ;;  %v799_v34 = vadd.f32 1e-07, %v797_v22  ;;  %v800_v59 = vadd.f32 1e-07, %v798_v23  ;;  %v456_v58 = vsub.s32 6, %v2410_v55 }
 0x1a7   : > { %v855_v24 = vmul.f32 0.40528473, %v853_v16  ;;  %v818_v43 = vsub.f32 %v816_v30, %v2420_v60  ;;  %v442_v55 = vrot.slane %v2400_v50, %v441_v37  ;;  %v446_v54 = vrot.slane %v2404_v51, %v441_v37  ;;  %v492_v20 = vpop.permute.xlu1 %491 }
 0x1a8   : > { %v832_v44 = vsub.f32 %v830_v31, %v2440_v12  ;;  %vm493_vm3 = vcmp.eq.s32.totalorder %v492_v20, 1 }
 0x1a9   : > { %v820_v56 = vmul.f32 %v818_v43, %v818_v43  ;;  %v474_v0 = vsub.f32 %v2420_v60, %v442_v55  ;;  %v475_v4 = vsub.f32 %v2420_v60, %v446_v54  ;;  %v2510_v43 = vadd.s32 128, %v2383_v32 }
 0x1aa   : > { %v834_v57 = vmul.f32 %v832_v44, %v832_v44 }
 0x1e0   : > { %v2394_v46 = vpop.f32.mrb[0].mxu0 }
 0x1e1   : > { %v2396_v47 = vpop.f32.mrb[1].mxu0 }
 0x1e2   : > { %v675_v48 = vpop.f32.mrb[2].mxu0 }
 0x1e3   : > { %v676_v49 = vpop.f32.mrb[3].mxu0 }
 0x204   : > { %v761_v35 = vpop.permute.xlu0 %760 }
 0x205   : > { %v771_v40 = vadd.f32 %v766_v27, %v761_v35  ;;  %v772_v41 = vadd.f32 %v770_v28, %v761_v35  ;;  %v829_v27 = vsub.f32 %v824_v18, %v2428_v3  ;;  %v856_v28 = vmul.f32 0.40528473, %v854_v19 }
 0x207   : > { %v773_v48 = vsub.f32 %v771_v40, %v743_v38  ;;  %v774_v49 = vsub.f32 %v772_v41, %v744_v39  ;;  %v817_v40 = vsub.f32 %v815_v26, %v2420_v60  ;;  %v831_v41 = vsub.f32 %v829_v27, %v2440_v12 }
 0x209   : > { %v775_v62 = vadd.f32 1e-07, %v773_v48  ;;  %v776_v63 = vadd.f32 1e-07, %v774_v49  ;;  %v461_v48 = vrot.slane %v2404_v51, %v456_v58  ;;  %v819_v49 = vmul.f32 %v817_v40, %v817_v40 }
 0x20a   : > { %v833_v53 = vmul.f32 %v831_v41, %v831_v41  ;;  %v836_v51 = vadd.f32 %v834_v57, %v820_v56 }
 0x20b   : > { %1795 = vrcp.f32 %v775_v62  ;;  %v467_v62 = vsub.f32 %v461_v48, %v2428_v3  ;;  %v481_v6 = vsub.f32 %v2440_v12, %v461_v48 }
 0x20c   : > { %1797 = vrcp.f32 %v776_v63  ;;  %v452_v63 = vsub.f32 %v442_v55, %v2406_v52  ;;  %v835_v2 = vadd.f32 %v833_v53, %v819_v49  ;;  %v838_v14 = vmul.f32 0.25, %v836_v51 }
 0x20d   : > { %1799 = vrcp.f32 %v799_v34  ;;  %v483_v13 = vmin.f32 %v475_v4, %v481_v6 }
 0x20e   : > { %1801 = vrcp.f32 %v800_v59  ;;  %v837_v10 = vmul.f32 0.25, %v835_v2 }
 0x215   : > { %v1796_v25 = vpop.eup %1795 }
 0x216   : > { %v1798_v29 = vpop.eup %1797  ;;  %v778_v33 = vmul.f32 %v1796_v25, %v743_v38 }
 0x217   : > { %v780_v35 = vmul.f32 %v1798_v29, %v744_v39  ;;  %v457_v39 = vrot.slane %v2400_v50, %v456_v58  ;;  %v453_v50 = vsub.f32 %v446_v54, %v2406_v52  ;;  %v1800_v7 = vpop.eup %1799 }
 0x218   : > { %v857_v36 = vsub.f32 %v855_v24, %v778_v33  ;;  %v1802_v8 = vpop.eup %1801  ;;  %v866_v19 = vmul.f32 %v1800_v7, %v837_v10 }
 0x219   : > { %v858_v42 = vsub.f32 %v856_v28, %v780_v35  ;;  %v466_v61 = vsub.f32 %v457_v39, %v2428_v3  ;;  %v480_v1 = vsub.f32 %v2440_v12, %v457_v39  ;;  %v469_v11 = vmin.f32 %v453_v50, %v467_v62 }
 0x21a   : > { %v859_v45 = vadd.f32 1.0000001, %v857_v36  ;;  %v868_v21 = vmul.f32 %v1802_v8, %v838_v14 }
 0x21b   : > { %v860_v38 = vadd.f32 1.0000001, %v858_v42  ;;  %v468_v5 = vmin.f32 %v452_v63, %v466_v61  ;;  %v482_v9 = vmin.f32 %v474_v0, %v480_v1  ;;  %v485_v60 = vmin.f32 %v469_v11, %v483_v13 }
 0x21c   : > { %1803 = vrcp.f32 %v859_v45 }
 0x21d   : > { %1805 = vrcp.f32 %v860_v38  ;;  %v484_v18 = vmin.f32 %v468_v5, %v482_v9  ;;  %vm487_vm5 = vcmp.gt.f32.partialorder %v485_v60, 1e-09 }
 0x21e   : > { %vm495_vm7 = vmand %vm487_vm5, %vm493_vm3 }
 0x21f   : > { %vm486_vm4 = vcmp.gt.f32.partialorder %v484_v18, 1e-09  ;;  %v679_v37 = vsel %vm495_vm7, %v2396_v47, 0.0 }
 0x220   : > { %vm2489_vm6 = vmand %vm486_vm4, %vm493_vm3  ;;  %vm949_vm3 = vcmp.eq.s32.totalorder %v2383_v32, 1 }
 0x221   : > { %v678_v58 = vsel %vm2489_vm6, %v2394_v46, 0.0 }
 0x226   : > { %v1804_v3 = vpop.eup %1803 }
 0x227   : > { %v1806_v15 = vpop.eup %1805  ;;  %v862_v16 = vmul.f32 %v1804_v3, %v855_v24 }
 0x228   : > { %v864_v17 = vmul.f32 %v1806_v15, %v856_v28 }
 0x229   : > { %v869_v52 = vmul.f32 %v862_v16, %v855_v24 }
 0x22a   : > { %v870_v12 = vmul.f32 %v864_v17, %v856_v28 }
 0x22b   : > { %v871_v22 = vadd.f32 %v869_v52, %v866_v19 }
 0x22c   : > { %v872_v23 = vadd.f32 %v870_v12, %v868_v21 }
 0x22d   : > { %v873_v25 = vsub.f32 %v778_v33, %v871_v22 }
 0x22e   : > { %v874_v26 = vsub.f32 %v780_v35, %v872_v23 }
 0x22f   : > { %v875_v27 = vmax.f32 %v873_v25, 0.0 }
 0x230   : > { %v876_v30 = vmax.f32 %v874_v26, 0.0 }
 0x231   : > { %v877_v24 = vsel %vm2489_vm6, %v875_v27, 0.0 }
 0x232   : > { %v878_v31 = vsel %vm495_vm7, %v876_v30, 0.0  ;;  %v879_v28 = vmul.f32 %v877_v24, %v877_v24  ;;  %894 = vst [vmem:[%s2496_s15] sm:$0xff] %v877_v24 }
 0x233   : > { %v880_v33 = vmul.f32 %v878_v31, %v878_v31  ;;  %895 = vst [vmem:[%s2496_s15 + $0x8] sm:$0xff] %v878_v31 }
 0x234   : > { %v881_v34 = vmul.f32 %v879_v28, %v879_v28 }
 0x235   : > { %v882_v35 = vmul.f32 %v880_v33, %v880_v33 }
 0x236   : > { %v883_v59 = vmul.f32 %v881_v34, %v879_v28 }
 0x237   : > { %v884_v36 = vmul.f32 %v882_v35, %v880_v33 }
 0x238   : > { %v885_v40 = vmul.f32 %v883_v59, %v678_v58 }
 0x239   : > { %v886_v41 = vmul.f32 %v884_v36, %v679_v37 }
 0x23a   : > { %892 = vst [vmem:[%s2505_s20] sm:$0xff] %v885_v40 }
 0x23b   : > { %v896_v42 = vmax.f32 %v885_v40, %v886_v41  ;;  %893 = vst [vmem:[%s2505_s20 + $0x8] sm:$0xff] %v886_v41 }
 0x23d   : > { %897 = vmax.xlane.f32.xlu0 %v896_v42 }
 0x2ca   : > { %v2512_v44 = vpop.xlane.xlu0 %897 }
 0x2cb   : > { %vm899_vm8 = vcmp.eq.f32.partialorder %v885_v40, %v2512_v44  ;;  %vm900_vm9 = vcmp.eq.f32.partialorder %v886_v41, %v2512_v44 }
 0x2cc   : > { %v901_v46 = vsel %vm899_vm8, %v2383_v32, 2147483647  ;;  %v902_v47 = vsel %vm900_vm9, %v2510_v43, 2147483647 }
 0x2cd   : > { %vm903_vm10 = vcmp.lt.s32.totalorder %v901_v46, %v902_v47 }
 0x2ce   : > { %v904_v45 = vsel %vm903_vm10, %v901_v46, %v902_v47  ;;  %vm979_vm10 = vcmp.eq.s32.totalorder %v2383_v32, 2 }
 0x2cf   : > { %v906_v38 = vshra.s32 %v904_v45, 16  ;;  %v905_v48 = vand.u32 65535, %v904_v45 }
 0x2d1   : > { %v908_v39 = vcvt.s32.f32 %v906_v38  ;;  %v907_v49 = vcvt.s32.f32 %v905_v48 }
 0x2d3   : > { %909 = vmin.xlane.f32.xlu1 %v908_v39 }
 0x360   : > { %v910_v55 = vpop.xlane.xlu1 %909 }
 0x361   : > { %vm911_vm11 = vcmp.eq.f32.partialorder %v908_v39, %v910_v55  ;;  %v916_v54 = vcvt.f32.s32 %v910_v55 }
 0x362   : > { %v912_v53 = vsel %vm911_vm11, %v907_v49, inf }
 0x363   : > { %913 = vmin.xlane.f32.xlu0 %v912_v53  ;;  %v917_v57 = vshll.u32 %v916_v54, 16 }
 0x3f0   : > { %v914_v56 = vpop.xlane.xlu0 %913 }
 0x3f1   : > { %v915_v61 = vcvt.f32.s32 %v914_v56 }
 0x3f3   : > { %v918_v62 = vadd.s32 %v917_v57, %v915_v61 }
 0x3f5   : > { %vm922_vm12 = vcmp.eq.s32.totalorder %v2383_v32, %v918_v62  ;;  %vm923_vm13 = vcmp.eq.s32.totalorder %v2510_v43, %v918_v62  ;;  %v921_v16 = vsel %vm919_vm2, %v918_v62, 0 }
 0x3f6   : > { %v924_v63 = vsel %vm922_vm12, -3e+38, %v885_v40  ;;  %v925_v0 = vsel %vm923_vm13, -3e+38, %v886_v41 }
 0x3f7   : > { %v926_v1 = vmax.f32 %v924_v63, %v925_v0 }
 0x3f9   : > { %927 = vmax.xlane.f32.xlu0 %v926_v1 }
 0x486   : > { %v2520_v2 = vpop.xlane.xlu0 %927 }
 0x487   : > { %vm929_vm14 = vcmp.eq.f32.partialorder %v924_v63, %v2520_v2  ;;  %vm930_vm15 = vcmp.eq.f32.partialorder %v925_v0, %v2520_v2 }
 0x488   : > { %v931_v50 = vsel %vm929_vm14, %v2383_v32, 2147483647  ;;  %v932_v4 = vsel %vm930_vm15, %v2510_v43, 2147483647 }
 0x489   : > { %vm933_vm0 = vcmp.lt.s32.totalorder %v931_v50, %v932_v4 }
 0x48a   : > { %v934_v6 = vsel %vm933_vm0, %v931_v50, %v932_v4 }
 0x48b   : > { %v936_v51 = vshra.s32 %v934_v6, 16  ;;  %v935_v8 = vand.u32 65535, %v934_v6 }
 0x48d   : > { %v938_v7 = vcvt.s32.f32 %v936_v51  ;;  %v937_v9 = vcvt.s32.f32 %v935_v8 }
 0x48f   : > { %939 = vmin.xlane.f32.xlu1 %v938_v7 }
 0x51c   : > { %v940_v5 = vpop.xlane.xlu1 %939 }
 0x51d   : > { %vm941_vm1 = vcmp.eq.f32.partialorder %v938_v7, %v940_v5  ;;  %v946_v3 = vcvt.f32.s32 %v940_v5 }
 0x51e   : > { %v942_v10 = vsel %vm941_vm1, %v937_v9, inf  ;;  %vm1009_vm1 = vcmp.eq.s32.totalorder %v2383_v32, 3 }
 0x51f   : > { %943 = vmin.xlane.f32.xlu0 %v942_v10  ;;  %v947_v13 = vshll.u32 %v946_v3, 16 }
 0x5ac   : > { %v944_v11 = vpop.xlane.xlu0 %943 }
 0x5ad   : > { %v945_v14 = vcvt.f32.s32 %v944_v11 }
 0x5af   : > { %v948_v15 = vadd.s32 %v947_v13, %v945_v14 }
 0x5b1   : > { %v951_v17 = vsel %vm949_vm3, %v948_v15, %v921_v16  ;;  %vm952_vm4 = vcmp.eq.s32.totalorder %v2383_v32, %v948_v15  ;;  %vm953_vm5 = vcmp.eq.s32.totalorder %v2510_v43, %v948_v15 }
 0x5b2   : > { %v954_v18 = vsel %vm952_vm4, -3e+38, %v924_v63  ;;  %v955_v19 = vsel %vm953_vm5, -3e+38, %v925_v0 }
 0x5b3   : > { %v956_v52 = vmax.f32 %v954_v18, %v955_v19 }
 0x5b5   : > { %957 = vmax.xlane.f32.xlu1 %v956_v52 }
 0x642   : > { %v2534_v20 = vpop.xlane.xlu1 %957 }
 0x643   : > { %vm959_vm6 = vcmp.eq.f32.partialorder %v954_v18, %v2534_v20  ;;  %vm960_vm7 = vcmp.eq.f32.partialorder %v955_v19, %v2534_v20 }
 0x644   : > { %v961_v60 = vsel %vm959_vm6, %v2383_v32, 2147483647  ;;  %v962_v21 = vsel %vm960_vm7, %v2510_v43, 2147483647 }
 0x645   : > { %vm963_vm8 = vcmp.lt.s32.totalorder %v961_v60, %v962_v21 }
 0x646   : > { %v964_v12 = vsel %vm963_vm8, %v961_v60, %v962_v21 }
 0x647   : > { %v966_v22 = vshra.s32 %v964_v12, 16  ;;  %v965_v25 = vand.u32 65535, %v964_v12 }
 0x649   : > { %v968_v23 = vcvt.s32.f32 %v966_v22  ;;  %v967_v27 = vcvt.s32.f32 %v965_v25 }
 0x64b   : > { %969 = vmin.xlane.f32.xlu0 %v968_v23 }
 0x6d8   : > { %v970_v26 = vpop.xlane.xlu0 %969 }
 0x6d9   : > { %vm971_vm9 = vcmp.eq.f32.partialorder %v968_v23, %v970_v26  ;;  %v976_v30 = vcvt.f32.s32 %v970_v26 }
 0x6da   : > { %v972_v29 = vsel %vm971_vm9, %v967_v27, inf }
 0x6db   : > { %973 = vmin.xlane.f32.xlu1 %v972_v29  ;;  %v977_v31 = vshll.u32 %v976_v30, 16 }
 0x768   : > { %v974_v24 = vpop.xlane.xlu1 %973 }
 0x769   : > { %v975_v28 = vcvt.f32.s32 %v974_v24 }
 0x76b   : > { %v978_v33 = vadd.s32 %v977_v31, %v975_v28 }
 0x76d   : > { %v981_v34 = vsel %vm979_vm10, %v978_v33, %v951_v17  ;;  %vm982_vm11 = vcmp.eq.s32.totalorder %v2383_v32, %v978_v33  ;;  %vm983_vm12 = vcmp.eq.s32.totalorder %v2510_v43, %v978_v33 }
 0x76e   : > { %v984_v35 = vsel %vm982_vm11, -3e+38, %v954_v18  ;;  %v985_v59 = vsel %vm983_vm12, -3e+38, %v955_v19  ;;  %vm1039_vm11 = vcmp.eq.s32.totalorder %v2383_v32, 4 }
 0x76f   : > { %v986_v58 = vmax.f32 %v984_v35, %v985_v59 }
 0x771   : > { %987 = vmax.xlane.f32.xlu0 %v986_v58 }
 0x7fe   : > { %v2545_v36 = vpop.xlane.xlu0 %987 }
 0x7ff   : > { %vm989_vm13 = vcmp.eq.f32.partialorder %v984_v35, %v2545_v36  ;;  %vm990_vm14 = vcmp.eq.f32.partialorder %v985_v59, %v2545_v36 }
 0x800   : > { %v991_v37 = vsel %vm989_vm13, %v2383_v32, 2147483647  ;;  %v992_v40 = vsel %vm990_vm14, %v2510_v43, 2147483647 }
 0x801   : > { %vm993_vm15 = vcmp.lt.s32.totalorder %v991_v37, %v992_v40 }
 0x802   : > { %v994_v41 = vsel %vm993_vm15, %v991_v37, %v992_v40 }
 0x803   : > { %v996_v42 = vshra.s32 %v994_v41, 16  ;;  %v995_v47 = vand.u32 65535, %v994_v41 }
 0x805   : > { %v998_v46 = vcvt.s32.f32 %v996_v42  ;;  %v997_v38 = vcvt.s32.f32 %v995_v47 }
 0x807   : > { %999 = vmin.xlane.f32.xlu1 %v998_v46 }
 0x894   : > { %v1000_v45 = vpop.xlane.xlu1 %999 }
 0x895   : > { %vm1001_vm0 = vcmp.eq.f32.partialorder %v998_v46, %v1000_v45  ;;  %v1006_v48 = vcvt.f32.s32 %v1000_v45 }
 0x896   : > { %v1002_v39 = vsel %vm1001_vm0, %v997_v38, inf }
 0x897   : > { %1003 = vmin.xlane.f32.xlu0 %v1002_v39  ;;  %v1007_v49 = vshll.u32 %v1006_v48, 16 }
 0x924   : > { %v1004_v55 = vpop.xlane.xlu0 %1003 }
 0x925   : > { %v1005_v53 = vcvt.f32.s32 %v1004_v55 }
 0x927   : > { %v1008_v54 = vadd.s32 %v1007_v49, %v1005_v53 }
 0x929   : > { %v1011_v56 = vsel %vm1009_vm1, %v1008_v54, %v981_v34  ;;  %vm1012_vm4 = vcmp.eq.s32.totalorder %v2383_v32, %v1008_v54  ;;  %vm1013_vm5 = vcmp.eq.s32.totalorder %v2510_v43, %v1008_v54 }
 0x92a   : > { %v1014_v57 = vsel %vm1012_vm4, -3e+38, %v984_v35  ;;  %v1015_v61 = vsel %vm1013_vm5, -3e+38, %v985_v59  ;;  %vm1069_vm5 = vcmp.eq.s32.totalorder %v2383_v32, 5 }
 0x92b   : > { %v1016_v62 = vmax.f32 %v1014_v57, %v1015_v61 }
 0x92d   : > { %1017 = vmax.xlane.f32.xlu1 %v1016_v62 }
 0x9ba   : > { %v2556_v63 = vpop.xlane.xlu1 %1017 }
 0x9bb   : > { %vm1019_vm6 = vcmp.eq.f32.partialorder %v1014_v57, %v2556_v63  ;;  %vm1020_vm7 = vcmp.eq.f32.partialorder %v1015_v61, %v2556_v63 }
 0x9bc   : > { %v1021_v0 = vsel %vm1019_vm6, %v2383_v32, 2147483647  ;;  %v1022_v1 = vsel %vm1020_vm7, %v2510_v43, 2147483647 }
 0x9bd   : > { %vm1023_vm8 = vcmp.lt.s32.totalorder %v1021_v0, %v1022_v1 }
 0x9be   : > { %v1024_v50 = vsel %vm1023_vm8, %v1021_v0, %v1022_v1 }
 0x9bf   : > { %v1026_v4 = vshra.s32 %v1024_v50, 16  ;;  %v1025_v51 = vand.u32 65535, %v1024_v50 }
 0x9c1   : > { %v1028_v6 = vcvt.s32.f32 %v1026_v4  ;;  %v1027_v8 = vcvt.s32.f32 %v1025_v51 }
 0x9c3   : > { %1029 = vmin.xlane.f32.xlu0 %v1028_v6 }
 0xa50   : > { %v1030_v7 = vpop.xlane.xlu0 %1029 }
 0xa51   : > { %vm1031_vm9 = vcmp.eq.f32.partialorder %v1028_v6, %v1030_v7  ;;  %v1036_v9 = vcvt.f32.s32 %v1030_v7 }
 0xa52   : > { %v1032_v5 = vsel %vm1031_vm9, %v1027_v8, inf }
 0xa53   : > { %1033 = vmin.xlane.f32.xlu1 %v1032_v5  ;;  %v1037_v3 = vshll.u32 %v1036_v9, 16 }
 0xae0   : > { %v1034_v10 = vpop.xlane.xlu1 %1033 }
 0xae1   : > { %v1035_v11 = vcvt.f32.s32 %v1034_v10 }
 0xae3   : > { %v1038_v13 = vadd.s32 %v1037_v3, %v1035_v11 }
 0xae5   : > { %v1041_v14 = vsel %vm1039_vm11, %v1038_v13, %v1011_v56  ;;  %vm1042_vm12 = vcmp.eq.s32.totalorder %v2383_v32, %v1038_v13  ;;  %vm1043_vm13 = vcmp.eq.s32.totalorder %v2510_v43, %v1038_v13 }
 0xae6   : > { %v1044_v15 = vsel %vm1042_vm12, -3e+38, %v1014_v57  ;;  %v1045_v16 = vsel %vm1043_vm13, -3e+38, %v1015_v61 }
 0xae7   : > { %v1046_v17 = vmax.f32 %v1044_v15, %v1045_v16 }
 0xae9   : > { %1047 = vmax.xlane.f32.xlu0 %v1046_v17 }
 0xb76   : > { %v2567_v18 = vpop.xlane.xlu0 %1047 }
 0xb77   : > { %vm1049_vm14 = vcmp.eq.f32.partialorder %v1044_v15, %v2567_v18  ;;  %vm1050_vm15 = vcmp.eq.f32.partialorder %v1045_v16, %v2567_v18 }
 0xb78   : > { %v1051_v19 = vsel %vm1049_vm14, %v2383_v32, 2147483647  ;;  %v1052_v52 = vsel %vm1050_vm15, %v2510_v43, 2147483647  ;;  %vm1099_vm14 = vcmp.eq.s32.totalorder %v2383_v32, 6 }
 0xb79   : > { %vm1053_vm0 = vcmp.lt.s32.totalorder %v1051_v19, %v1052_v52 }
 0xb7a   : > { %v1054_v60 = vsel %vm1053_vm0, %v1051_v19, %v1052_v52 }
 0xb7b   : > { %v1056_v21 = vshra.s32 %v1054_v60, 16  ;;  %v1055_v22 = vand.u32 65535, %v1054_v60 }
 0xb7d   : > { %v1058_v12 = vcvt.s32.f32 %v1056_v21  ;;  %v1057_v25 = vcvt.s32.f32 %v1055_v22 }
 0xb7f   : > { %1059 = vmin.xlane.f32.xlu1 %v1058_v12 }
 0xc0c   : > { %v1060_v23 = vpop.xlane.xlu1 %1059 }
 0xc0d   : > { %vm1061_vm4 = vcmp.eq.f32.partialorder %v1058_v12, %v1060_v23  ;;  %v1066_v27 = vcvt.f32.s32 %v1060_v23 }
 0xc0e   : > { %v1062_v26 = vsel %vm1061_vm4, %v1057_v25, inf }
 0xc0f   : > { %1063 = vmin.xlane.f32.xlu0 %v1062_v26  ;;  %v1067_v30 = vshll.u32 %v1066_v27, 16 }
 0xc9c   : > { %v1064_v29 = vpop.xlane.xlu0 %1063 }
 0xc9d   : > { %v1065_v24 = vcvt.f32.s32 %v1064_v29 }
 0xc9f   : > { %v1068_v31 = vadd.s32 %v1067_v30, %v1065_v24 }
 0xca1   : > { %v1071_v28 = vsel %vm1069_vm5, %v1068_v31, %v1041_v14  ;;  %vm1072_vm6 = vcmp.eq.s32.totalorder %v2383_v32, %v1068_v31  ;;  %vm1073_vm7 = vcmp.eq.s32.totalorder %v2510_v43, %v1068_v31 }
 0xca2   : > { %v1074_v33 = vsel %vm1072_vm6, -3e+38, %v1044_v15  ;;  %v1075_v34 = vsel %vm1073_vm7, -3e+38, %v1045_v16 }
 0xca3   : > { %v1076_v35 = vmax.f32 %v1074_v33, %v1075_v34 }
 0xca5   : > { %1077 = vmax.xlane.f32.xlu1 %v1076_v35 }
 0xd32   : > { %v2578_v59 = vpop.xlane.xlu1 %1077 }
 0xd33   : > { %vm1079_vm8 = vcmp.eq.f32.partialorder %v1074_v33, %v2578_v59  ;;  %vm1080_vm9 = vcmp.eq.f32.partialorder %v1075_v34, %v2578_v59 }
 0xd34   : > { %v1081_v58 = vsel %vm1079_vm8, %v2383_v32, 2147483647  ;;  %v1082_v37 = vsel %vm1080_vm9, %v2510_v43, 2147483647  ;;  %vm1129_vm9 = vcmp.eq.s32.totalorder %v2383_v32, 7 }
 0xd35   : > { %vm1083_vm12 = vcmp.lt.s32.totalorder %v1081_v58, %v1082_v37 }
 0xd36   : > { %v1084_v40 = vsel %vm1083_vm12, %v1081_v58, %v1082_v37 }
 0xd37   : > { %v1086_v41 = vshra.s32 %v1084_v40, 16  ;;  %v1085_v46 = vand.u32 65535, %v1084_v40 }
 0xd39   : > { %v1088_v42 = vcvt.s32.f32 %v1086_v41  ;;  %v1087_v45 = vcvt.s32.f32 %v1085_v46 }
 0xd3b   : > { %1089 = vmin.xlane.f32.xlu0 %v1088_v42 }
 0xdc8   : > { %v1090_v47 = vpop.xlane.xlu0 %1089 }
 0xdc9   : > { %vm1091_vm13 = vcmp.eq.f32.partialorder %v1088_v42, %v1090_v47  ;;  %v1096_v39 = vcvt.f32.s32 %v1090_v47 }
 0xdca   : > { %v1092_v38 = vsel %vm1091_vm13, %v1087_v45, inf }
 0xdcb   : > { %1093 = vmin.xlane.f32.xlu1 %v1092_v38  ;;  %v1097_v55 = vshll.u32 %v1096_v39, 16 }
 0xe58   : > { %v1094_v48 = vpop.xlane.xlu1 %1093 }
 0xe59   : > { %v1095_v49 = vcvt.f32.s32 %v1094_v48 }
 0xe5b   : > { %v1098_v53 = vadd.s32 %v1097_v55, %v1095_v49 }
 0xe5d   : > { %v1101_v54 = vsel %vm1099_vm14, %v1098_v53, %v1071_v28  ;;  %vm1102_vm15 = vcmp.eq.s32.totalorder %v2383_v32, %v1098_v53  ;;  %vm1103_vm0 = vcmp.eq.s32.totalorder %v2510_v43, %v1098_v53 }
 0xe5e   : > { %v1104_v56 = vsel %vm1102_vm15, -3e+38, %v1074_v33  ;;  %v1105_v57 = vsel %vm1103_vm0, -3e+38, %v1075_v34 }
 0xe5f   : > { %v1106_v61 = vmax.f32 %v1104_v56, %v1105_v57 }
 0xe61   : > { %1107 = vmax.xlane.f32.xlu0 %v1106_v61 }
 0xeee   : > { %v2589_v62 = vpop.xlane.xlu0 %1107 }
 0xeef   : > { %vm1109_vm4 = vcmp.eq.f32.partialorder %v1104_v56, %v2589_v62  ;;  %vm1110_vm6 = vcmp.eq.f32.partialorder %v1105_v57, %v2589_v62 }
 0xef0   : > { %v1111_v0 = vsel %vm1109_vm4, %v2383_v32, 2147483647  ;;  %v1112_v1 = vsel %vm1110_vm6, %v2510_v43, 2147483647 }
 0xef1   : > { %vm1113_vm7 = vcmp.lt.s32.totalorder %v1111_v0, %v1112_v1 }
 0xef2   : > { %v1114_v50 = vsel %vm1113_vm7, %v1111_v0, %v1112_v1  ;;  %vm1159_vm7 = vcmp.eq.s32.totalorder %v2383_v32, 8 }
 0xef3   : > { %v1116_v4 = vshra.s32 %v1114_v50, 16  ;;  %v1115_v51 = vand.u32 65535, %v1114_v50 }
 0xef5   : > { %v1118_v6 = vcvt.s32.f32 %v1116_v4  ;;  %v1117_v8 = vcvt.s32.f32 %v1115_v51 }
 0xef7   : > { %1119 = vmin.xlane.f32.xlu1 %v1118_v6 }
 0xf84   : > { %v1120_v7 = vpop.xlane.xlu1 %1119 }
 0xf85   : > { %vm1121_vm8 = vcmp.eq.f32.partialorder %v1118_v6, %v1120_v7  ;;  %v1126_v9 = vcvt.f32.s32 %v1120_v7 }
 0xf86   : > { %v1122_v5 = vsel %vm1121_vm8, %v1117_v8, inf }
 0xf87   : > { %1123 = vmin.xlane.f32.xlu0 %v1122_v5  ;;  %v1127_v3 = vshll.u32 %v1126_v9, 16 }
0x1014   : > { %v1124_v10 = vpop.xlane.xlu0 %1123 }
0x1015   : > { %v1125_v11 = vcvt.f32.s32 %v1124_v10 }
0x1017   : > { %v1128_v13 = vadd.s32 %v1127_v3, %v1125_v11 }
0x1019   : > { %v1131_v14 = vsel %vm1129_vm9, %v1128_v13, %v1101_v54  ;;  %vm1132_vm12 = vcmp.eq.s32.totalorder %v2383_v32, %v1128_v13  ;;  %vm1133_vm13 = vcmp.eq.s32.totalorder %v2510_v43, %v1128_v13 }
0x101a   : > { %v1134_v15 = vsel %vm1132_vm12, -3e+38, %v1104_v56  ;;  %v1135_v16 = vsel %vm1133_vm13, -3e+38, %v1105_v57 }
0x101b   : > { %v1136_v17 = vmax.f32 %v1134_v15, %v1135_v16 }
0x101d   : > { %1137 = vmax.xlane.f32.xlu1 %v1136_v17 }
0x10aa   : > { %v2600_v19 = vpop.xlane.xlu1 %1137 }
0x10ab   : > { %vm1139_vm15 = vcmp.eq.f32.partialorder %v1134_v15, %v2600_v19  ;;  %vm1140_vm0 = vcmp.eq.f32.partialorder %v1135_v16, %v2600_v19 }
0x10ac   : > { %v1141_v52 = vsel %vm1139_vm15, %v2383_v32, 2147483647  ;;  %v1142_v60 = vsel %vm1140_vm0, %v2510_v43, 2147483647 }
0x10ad   : > { %vm1143_vm4 = vcmp.lt.s32.totalorder %v1141_v52, %v1142_v60 }
0x10ae   : > { %v1144_v21 = vsel %vm1143_vm4, %v1141_v52, %v1142_v60 }
0x10af   : > { %v1146_v12 = vshra.s32 %v1144_v21, 16  ;;  %v1145_v23 = vand.u32 65535, %v1144_v21 }
0x10b1   : > { %v1148_v22 = vcvt.s32.f32 %v1146_v12  ;;  %v1147_v26 = vcvt.s32.f32 %v1145_v23 }
0x10b3   : > { %1149 = vmin.xlane.f32.xlu0 %v1148_v22 }
0x1140   : > { %v1150_v25 = vpop.xlane.xlu0 %1149 }
0x1141   : > { %vm1151_vm6 = vcmp.eq.f32.partialorder %v1148_v22, %v1150_v25  ;;  %v1156_v29 = vcvt.f32.s32 %v1150_v25 }
0x1142   : > { %v1152_v27 = vsel %vm1151_vm6, %v1147_v26, inf  ;;  %vm1189_vm6 = vcmp.eq.s32.totalorder %v2383_v32, 9 }
0x1143   : > { %1153 = vmin.xlane.f32.xlu1 %v1152_v27  ;;  %v1157_v24 = vshll.u32 %v1156_v29, 16 }
0x11d0   : > { %v1154_v30 = vpop.xlane.xlu1 %1153 }
0x11d1   : > { %v1155_v31 = vcvt.f32.s32 %v1154_v30 }
0x11d3   : > { %v1158_v28 = vadd.s32 %v1157_v24, %v1155_v31 }
0x11d5   : > { %v1161_v33 = vsel %vm1159_vm7, %v1158_v28, %v1131_v14  ;;  %vm1162_vm8 = vcmp.eq.s32.totalorder %v2383_v32, %v1158_v28  ;;  %vm1163_vm12 = vcmp.eq.s32.totalorder %v2510_v43, %v1158_v28 }
0x11d6   : > { %v1164_v34 = vsel %vm1162_vm8, -3e+38, %v1134_v15  ;;  %v1165_v35 = vsel %vm1163_vm12, -3e+38, %v1135_v16 }
0x11d7   : > { %v1166_v58 = vmax.f32 %v1164_v34, %v1165_v35 }
0x11d9   : > { %1167 = vmax.xlane.f32.xlu0 %v1166_v58 }
0x1266   : > { %v2611_v37 = vpop.xlane.xlu0 %1167 }
0x1267   : > { %vm1169_vm13 = vcmp.eq.f32.partialorder %v1164_v34, %v2611_v37  ;;  %vm1170_vm15 = vcmp.eq.f32.partialorder %v1165_v35, %v2611_v37 }
0x1268   : > { %v1171_v40 = vsel %vm1169_vm13, %v2383_v32, 2147483647  ;;  %v1172_v41 = vsel %vm1170_vm15, %v2510_v43, 2147483647 }
0x1269   : > { %vm1173_vm0 = vcmp.lt.s32.totalorder %v1171_v40, %v1172_v41 }
0x126a   : > { %v1174_v42 = vsel %vm1173_vm0, %v1171_v40, %v1172_v41 }
0x126b   : > { %v1176_v46 = vshra.s32 %v1174_v42, 16  ;;  %v1175_v45 = vand.u32 65535, %v1174_v42 }
0x126d   : > { %v1178_v47 = vcvt.s32.f32 %v1176_v46  ;;  %v1177_v39 = vcvt.s32.f32 %v1175_v45 }
0x126f   : > { %1179 = vmin.xlane.f32.xlu1 %v1178_v47 }
0x12fc   : > { %v1180_v38 = vpop.xlane.xlu1 %1179 }
0x12fd   : > { %vm1181_vm4 = vcmp.eq.f32.partialorder %v1178_v47, %v1180_v38  ;;  %v1186_v55 = vcvt.f32.s32 %v1180_v38  ;;  %v920_v47 = vsel %vm919_vm2, %v2512_v44, 0.0  ;;  %vm1279_vm2 = vcmp.eq.s32.totalorder %v2383_v32, 12 }
0x12fe   : > { %v1182_v48 = vsel %vm1181_vm4, %v1177_v39, inf  ;;  %v950_v45 = vsel %vm949_vm3, %v2520_v2, %v920_v47  ;;  %vm2880_vm3 = vcmp.eq.s32.totalorder %v2383_v32, 10 }
0x12ff   : > { %1183 = vmin.xlane.f32.xlu0 %v1182_v48  ;;  %v1187_v53 = vshll.u32 %v1186_v55, 16  ;;  %v980_v38 = vsel %vm979_vm10, %v2534_v20, %v950_v45  ;;  %vm1282_vm10 = vcmask 105472  }
0x1300   : > { %v1010_v39 = vsel %vm1009_vm1, %v2545_v36, %v980_v38 }
0x1301   : > { %v1040_v48 = vsel %vm1039_vm11, %v2556_v63, %v1010_v39 }
0x1302   : > { %v1070_v44 = vsel %vm1069_vm5, %v2567_v18, %v1040_v48 }
0x1303   : > { %v1100_v2 = vsel %vm1099_vm14, %v2578_v59, %v1070_v44 }
0x1304   : > { %v1130_v20 = vsel %vm1129_vm9, %v2589_v62, %v1100_v2 }
0x1305   : > { %v1160_v36 = vsel %vm1159_vm7, %v2600_v19, %v1130_v20 }
0x1306   : > { %v1190_v63 = vsel %vm1189_vm6, %v2611_v37, %v1160_v36 }
0x138c   : > { %v1184_v49 = vpop.xlane.xlu0 %1183 }
0x138d   : > { %v1185_v54 = vcvt.f32.s32 %v1184_v49 }
0x138f   : > { %v1188_v56 = vadd.s32 %v1187_v53, %v1185_v54 }
0x1391   : > { %v1191_v57 = vsel %vm1189_vm6, %v1188_v56, %v1161_v33  ;;  %vm1192_vm8 = vcmp.eq.s32.totalorder %v2383_v32, %v1188_v56  ;;  %vm1193_vm12 = vcmp.eq.s32.totalorder %v2510_v43, %v1188_v56 }
0x1392   : > { %v1194_v61 = vsel %vm1192_vm8, -3e+38, %v1164_v34  ;;  %v1195_v0 = vsel %vm1193_vm12, -3e+38, %v1165_v35  ;;  %vm2857_vm8 = vcmp.eq.s32.totalorder %v2383_v32, 10 }
0x1393   : > { %v1196_v1 = vmax.f32 %v1194_v61, %v1195_v0 }
0x1395   : > { %1197 = vmax.xlane.f32.xlu1 %v1196_v1 }
0x1422   : > { %v2622_v50 = vpop.xlane.xlu1 %1197 }
0x1423   : > { %vm1199_vm13 = vcmp.eq.f32.partialorder %v1194_v61, %v2622_v50  ;;  %vm1200_vm15 = vcmp.eq.f32.partialorder %v1195_v0, %v2622_v50  ;;  %v1220_v18 = vsel %vm2880_vm3, %v2622_v50, %v1190_v63 }
0x1424   : > { %v1201_v4 = vsel %vm1199_vm13, %v2383_v32, 2147483647  ;;  %v1202_v6 = vsel %vm1200_vm15, %v2510_v43, 2147483647 }
0x1425   : > { %vm1203_vm0 = vcmp.lt.s32.totalorder %v1201_v4, %v1202_v6 }
0x1426   : > { %v1204_v51 = vsel %vm1203_vm0, %v1201_v4, %v1202_v6 }
0x1427   : > { %v1206_v7 = vshra.s32 %v1204_v51, 16  ;;  %v1205_v5 = vand.u32 65535, %v1204_v51 }
0x1429   : > { %v1208_v8 = vcvt.s32.f32 %v1206_v7  ;;  %v1207_v10 = vcvt.s32.f32 %v1205_v5 }
0x142b   : > { %1209 = vmin.xlane.f32.xlu0 %v1208_v8 }
0x14b8   : > { %v1210_v9 = vpop.xlane.xlu0 %1209 }
0x14b9   : > { %vm1211_vm4 = vcmp.eq.f32.partialorder %v1208_v8, %v1210_v9  ;;  %v1216_v11 = vcvt.f32.s32 %v1210_v9 }
0x14ba   : > { %v1212_v3 = vsel %vm1211_vm4, %v1207_v10, inf }
0x14bb   : > { %1213 = vmin.xlane.f32.xlu1 %v1212_v3  ;;  %v1217_v14 = vshll.u32 %v1216_v11, 16 }
0x1548   : > { %v1214_v13 = vpop.xlane.xlu1 %1213 }
0x1549   : > { %v1215_v15 = vcvt.f32.s32 %v1214_v13 }
0x154b   : > { %v1218_v16 = vadd.s32 %v1217_v14, %v1215_v15 }
0x154d   : > { %v1221_v17 = vsel %vm2857_vm8, %v1218_v16, %v1191_v57  ;;  %vm1222_vm12 = vcmp.eq.s32.totalorder %v2383_v32, %v1218_v16  ;;  %vm1223_vm13 = vcmp.eq.s32.totalorder %v2510_v43, %v1218_v16 }
0x154e   : > { %v1224_v52 = vsel %vm1222_vm12, -3e+38, %v1194_v61  ;;  %v1225_v60 = vsel %vm1223_vm13, -3e+38, %v1195_v0  ;;  %vm1249_vm12 = vcmp.eq.s32.totalorder %v2383_v32, 11 }
0x154f   : > { %v1226_v21 = vmax.f32 %v1224_v52, %v1225_v60 }
0x1551   : > { %1227 = vmax.xlane.f32.xlu0 %v1226_v21 }
0x15de   : > { %v1228_v12 = vpop.xlane.xlu0 %1227 }
0x15df   : > { %vm1229_vm15 = vcmp.eq.f32.partialorder %v1224_v52, %v1228_v12  ;;  %vm1230_vm0 = vcmp.eq.f32.partialorder %v1225_v60, %v1228_v12  ;;  %v1250_v59 = vsel %vm1249_vm12, %v1228_v12, %v1220_v18 }
0x15e0   : > { %v1231_v22 = vsel %vm1229_vm15, %v2383_v32, 2147483647  ;;  %v1232_v23 = vsel %vm1230_vm0, %v2510_v43, 2147483647 }
0x15e1   : > { %vm1233_vm4 = vcmp.lt.s32.totalorder %v1231_v22, %v1232_v23 }
0x15e2   : > { %v1234_v25 = vsel %vm1233_vm4, %v1231_v22, %v1232_v23 }
0x15e3   : > { %v1236_v26 = vshra.s32 %v1234_v25, 16  ;;  %v1235_v29 = vand.u32 65535, %v1234_v25 }
0x15e5   : > { %v1238_v27 = vcvt.s32.f32 %v1236_v26  ;;  %v1237_v24 = vcvt.s32.f32 %v1235_v29 }
0x15e7   : > { %1239 = vmin.xlane.f32.xlu1 %v1238_v27 }
0x1674   : > { %v1240_v30 = vpop.xlane.xlu1 %1239 }
0x1675   : > { %vm1241_vm8 = vcmp.eq.f32.partialorder %v1238_v27, %v1240_v30  ;;  %v1246_v28 = vcvt.f32.s32 %v1240_v30 }
0x1676   : > { %v1242_v31 = vsel %vm1241_vm8, %v1237_v24, inf }
0x1677   : > { %1243 = vmin.xlane.f32.xlu0 %v1242_v31  ;;  %v1247_v34 = vshll.u32 %v1246_v28, 16 }
0x1704   : > { %v1244_v33 = vpop.xlane.xlu0 %1243 }
0x1705   : > { %v1245_v35 = vcvt.f32.s32 %v1244_v33 }
0x1707   : > { %v1248_v58 = vadd.s32 %v1247_v34, %v1245_v35 }
0x1709   : > { %v2638_v40 = vsel %vm1249_vm12, %v1248_v58, %v1221_v17  ;;  %vm1252_vm13 = vcmp.eq.s32.totalorder %v2383_v32, %v1248_v58  ;;  %vm1253_vm15 = vcmp.eq.s32.totalorder %v2510_v43, %v1248_v58 }
0x170a   : > { %v1254_v41 = vsel %vm1252_vm13, -3e+38, %v1224_v52  ;;  %v1255_v42 = vsel %vm1253_vm15, -3e+38, %v1225_v60 }
0x170b   : > { %v1256_v46 = vmax.f32 %v1254_v41, %v1255_v42 }
0x170d   : > { %1257 = vmax.xlane.f32.xlu1 %v1256_v46 }
0x179a   : > { %v1258_v55 = vpop.xlane.xlu1 %1257 }
0x179b   : > { %vm1259_vm1 = vcmp.eq.f32.partialorder %v1254_v41, %v1258_v55  ;;  %vm1260_vm11 = vcmp.eq.f32.partialorder %v1255_v42, %v1258_v55  ;;  %v1280_v62 = vsel %vm1279_vm2, %v1258_v55, %v1250_v59 }
0x179c   : > { %v1261_v19 = vsel %vm1259_vm1, %v2383_v32, 2147483647  ;;  %v1262_v37 = vsel %vm1260_vm11, %v2510_v43, 2147483647  ;;  %1283 = vst.msk [vmem:[%s390_s8] sm:$0xff] %vm1282_vm10, %v1280_v62 }
0x179d   : > { %vm1263_vm5 = vcmp.lt.s32.totalorder %v1261_v19, %v1262_v37 }
0x179e   : > { %v1264_v49 = vsel %vm1263_vm5, %v1261_v19, %v1262_v37 }
0x179f   : > { %v1266_v53 = vshra.s32 %v1264_v49, 16  ;;  %v1265_v56 = vand.u32 65535, %v1264_v49 }
0x17a1   : > { %v1268_v54 = vcvt.s32.f32 %v1266_v53  ;;  %v1267_v61 = vcvt.s32.f32 %v1265_v56 }
0x17a3   : > { %1269 = vmin.xlane.f32.xlu0 %v1268_v54 }
0x1830   : > { %v2686_v57 = vpop.xlane.xlu0 %1269 }
0x1831   : > { %vm1271_vm14 = vcmp.eq.f32.partialorder %v1268_v54, %v2686_v57 }
0x1832   : > { %v1272_v0 = vsel %vm1271_vm14, %v1267_v61, inf }
0x1833   : > { %1273 = vmin.xlane.f32.xlu1 %v1272_v0 }
0x1834   : > { %1910 = shalt.err (!%p1907_p13)
}
0x1835   : > { %s1911_s27 = scalar_lea.hbm %s2696_s29, 256  ;;  %s1915_s9 = scalar_lea.hbm %s2846_s4, 512 }
0x1836   : > { %p1912_p2 = scmp.ne.s32.totalorder %s2696_s29, %s1911_s27  ;;  %p1916_p7 = scmp.lt.u32.totalorder %s2696_s29, %s2846_s4 }
0x1837   : > { %p1917_p3 = scmp.lt.u32.totalorder %s1915_s9, %s1911_s27  ;;  %p1919_p4 = scmp.lt.u32.totalorder %s1911_s27, %s2696_s29 }
0x1838   : > { %p1913_p11 = pnand %p1912_p2, %p2881_p10 }
0x1839   : > { %p1918_p0 = por %p1917_p3, %p1916_p7 }
0x183a   : > { %p1914_p5 = pneg %p1913_p11 }
0x183b   : > { %p1920_p12 = por %p1919_p4, %p1918_p0 }
0x183d   : > { %p1921_p1 = pnand %p1920_p12, %p1914_p5 }
0x183f   : > { %1924 = shalt.err (!%p1921_p1)
}
0x1840   : > { %1678 = dma.vmem_to_hbm [thread:$0]  (%p2881_p10), %s1334_s30, 256, %s2696_s29, %s2700_s11  }
0x1841   : > { %s2725_s19 = scalar_lea.hbm %s2845_s3, %s1641_s14  ;;  %s1317_s16 = sshll.u32 %s2505_s20, 4  ;;  %s2728_s16 = int_to_ptr.vmem [resolvable:$true] %s1317_s16 }
0x1842   : > { %s1635_s7 = sshll.u32 %s2067_s24, 7  ;;  %s1286_s28 = scalar_lea.sflag [#allocation4], %s2321_s26 }
0x1843   : > { %s1925_s27 = scalar_lea.vmem %s2728_s16, 256  ;;  %s2093_s30 = smov [#allocation8]  }
0x1844   : > { %p1926_p8 = scmp.ne.s32.totalorder %s2728_s16, %s1925_s27  ;;  %s1929_s29 = sshll.u32 %s2093_s30, 4  ;;  %s1930_s29 = int_to_ptr.vmem [resolvable:$false] %s1929_s29 }
0x1845   : > { %s1931_s0 = scalar_lea.vmem %s1930_s29, 512  ;;  %p1932_p13 = scmp.lt.s32.totalorder %s2728_s16, %s1930_s29 }
0x1846   : > { %p1927_p9 = pnand %p1926_p8, %p2881_p10  ;;  %p1933_p2 = scmp.lt.s32.totalorder %s1931_s0, %s1925_s27 }
0x1848   : > { %p1928_p6 = pneg %p1927_p9  ;;  %p1934_p11 = por %p1933_p2, %p1932_p13 }
0x184a   : > { %p1935_p5 = pnand %p1934_p11, %p1928_p6 }
0x184c   : > { %1938 = shalt.err (!%p1935_p5)
}
0x184d   : > { %s1939_s20 = scalar_lea.hbm %s2725_s19, 256  ;;  %s1943_s9 = scalar_lea.hbm %s2845_s3, 512 }
0x184e   : > { %p1940_p7 = scmp.ne.s32.totalorder %s2725_s19, %s1939_s20  ;;  %p1944_p4 = scmp.lt.u32.totalorder %s2725_s19, %s2845_s3 }
0x184f   : > { %p1945_p12 = scmp.lt.u32.totalorder %s1943_s9, %s1939_s20  ;;  %p1947_p8 = scmp.lt.u32.totalorder %s1939_s20, %s2725_s19 }
0x1850   : > { %p1941_p3 = pnand %p1940_p7, %p2881_p10 }
0x1851   : > { %p1946_p1 = por %p1945_p12, %p1944_p4 }
0x1852   : > { %p1942_p0 = pneg %p1941_p3 }
0x1853   : > { %p1948_p9 = por %p1947_p8, %p1946_p1 }
0x1855   : > { %p1949_p6 = pnand %p1948_p9, %p1942_p0 }
0x1857   : > { %1952 = shalt.err (!%p1949_p6)
}
0x1858   : > { %1677 = dma.vmem_to_hbm [thread:$0]  (%p2881_p10), %s2728_s16, 256, %s2725_s19, %s1286_s28  }
0x1859   : > { %s2758_s27 = scalar_lea.hbm %s2847_s5, %s1635_s7  ;;  %s1347_s30 = sshll.u32 %s390_s8, 4  ;;  %s1348_s30 = int_to_ptr.vmem [resolvable:$true] %s1347_s30 }
0x185a   : > { %s1953_s29 = scalar_lea.vmem %s1348_s30, 128  ;;  %s2094_s0 = smov [#allocation11]  }
0x185b   : > { %p1954_p13 = scmp.ne.s32.totalorder %s1348_s30, %s1953_s29  ;;  %s1957_s20 = sshll.u32 %s2094_s0, 4  ;;  %s1958_s20 = int_to_ptr.vmem [resolvable:$false] %s1957_s20 }
0x185c   : > { %s1959_s14 = scalar_lea.vmem %s1958_s20, 256  ;;  %p1960_p5 = scmp.lt.s32.totalorder %s1348_s30, %s1958_s20 }
0x185d   : > { %p1955_p2 = pnand %p1954_p13, %p2881_p10  ;;  %p1961_p7 = scmp.lt.s32.totalorder %s1959_s14, %s1953_s29 }
0x185f   : > { %p1956_p11 = pneg %p1955_p2  ;;  %p1962_p3 = por %p1961_p7, %p1960_p5 }
0x1861   : > { %p1963_p0 = pnand %p1962_p3, %p1956_p11 }
0x1863   : > { %1966 = shalt.err (!%p1963_p0)
}
0x1864   : > { %s1967_s8 = scalar_lea.hbm %s2758_s27, 128  ;;  %s1971_s28 = scalar_lea.hbm %s2847_s5, 256 }
0x1865   : > { %p1968_p4 = scmp.ne.s32.totalorder %s2758_s27, %s1967_s8  ;;  %p1972_p8 = scmp.lt.u32.totalorder %s2758_s27, %s2847_s5 }
0x1866   : > { %p1973_p9 = scmp.lt.u32.totalorder %s1971_s28, %s1967_s8  ;;  %p1975_p13 = scmp.lt.u32.totalorder %s1967_s8, %s2758_s27 }
0x1867   : > { %p1969_p12 = pnand %p1968_p4, %p2881_p10 }
0x1868   : > { %p1974_p6 = por %p1973_p9, %p1972_p8 }
0x1869   : > { %p1970_p1 = pneg %p1969_p12 }
0x186a   : > { %p1976_p2 = por %p1975_p13, %p1974_p6 }
0x186c   : > { %p1977_p11 = pnand %p1976_p2, %p1970_p1 }
0x186e   : > { %1980 = shalt.err (!%p1977_p11)
}
0x186f   : > { %1679 = dma.vmem_to_hbm [thread:$0]  (%p2881_p10), %s1348_s30, 128, %s2758_s27, %s2700_s11   ;;  %v1276_v43 = vcvt.f32.s32 %v2686_v57 }
0x1870   : > { %s397_s13 = scalar_lea.vmem [#allocation12], %s2343_s18  ;;  %s2787_s29 = scalar_lea.hbm %s2848_s6, %s1635_s7 }
0x1871   : > { %v1277_v50 = vshll.u32 %v1276_v43, 16  ;;  %s1361_s15 = sshll.u32 %s397_s13, 4  ;;  %s1301_s18 = scalar_lea.sflag [#allocation13], %s2321_s26  ;;  %s2789_s15 = int_to_ptr.vmem [resolvable:$true] %s1361_s15 }
0x1872   : > { %s1981_s11 = scalar_lea.vmem %s2789_s15, 128  ;;  %s2095_s24 = smov [#allocation12]  }
0x1873   : > { %p1982_p5 = scmp.ne.s32.totalorder %s2789_s15, %s1981_s11  ;;  %s1985_s7 = sshll.u32 %s2095_s24, 4  ;;  %s1986_s7 = int_to_ptr.vmem [resolvable:$false] %s1985_s7 }
0x1874   : > { %s1987_s27 = scalar_lea.vmem %s1986_s7, 256  ;;  %p1988_p0 = scmp.lt.s32.totalorder %s2789_s15, %s1986_s7 }
0x1875   : > { %p1983_p7 = pnand %p1982_p5, %p2881_p10  ;;  %p1989_p4 = scmp.lt.s32.totalorder %s1987_s27, %s1981_s11 }
0x1877   : > { %p1984_p3 = pneg %p1983_p7  ;;  %p1990_p12 = por %p1989_p4, %p1988_p0 }
0x1879   : > { %p1991_p1 = pnand %p1990_p12, %p1984_p3 }
0x18c0   : > { %v1274_v1 = vpop.xlane.xlu1 %1273 }
0x18c1   : > { %v1275_v4 = vcvt.f32.s32 %v1274_v1 }
0x18c3   : > { %v1278_v6 = vadd.s32 %v1277_v50, %v1275_v4 }
0x18c5   : > { %v1281_v51 = vsel %vm1279_vm2, %v1278_v6, %v2638_v40 }
0x18c6   : > { %1284 = vst.msk [vmem:[%s397_s13] sm:$0xff] %vm1282_vm10, %v1281_v51 }
0x18c7   : > { %1994 = shalt.err (!%p1991_p1)
}
0x18c8   : > { %s1995_s26 = scalar_lea.hbm %s2787_s29, 128  ;;  %s1999_s20 = scalar_lea.hbm %s2848_s6, 256 }
0x18c9   : > { %p1996_p8 = scmp.ne.s32.totalorder %s2787_s29, %s1995_s26  ;;  %p2000_p13 = scmp.lt.u32.totalorder %s2787_s29, %s2848_s6 }
0x18ca   : > { %p2001_p2 = scmp.lt.u32.totalorder %s1999_s20, %s1995_s26  ;;  %p2003_p5 = scmp.lt.u32.totalorder %s1995_s26, %s2787_s29 }
0x18cb   : > { %p1997_p9 = pnand %p1996_p8, %p2881_p10 }
0x18cc   : > { %p2002_p11 = por %p2001_p2, %p2000_p13 }
0x18cd   : > { %p1998_p6 = pneg %p1997_p9 }
0x18ce   : > { %p2004_p7 = por %p2003_p5, %p2002_p11 }
0x18d0   : > { %p2005_p3 = pnand %p2004_p7, %p1998_p6 }
0x18d2   : > { %2008 = shalt.err (!%p2005_p3)
}
0x18d3   : > { %1680 = dma.vmem_to_hbm [thread:$0]  (%p2881_p10), %s2789_s15, 128, %s2787_s29, %s1301_s18  }
0x18d4 PF: > { %s2882_s19 = sld [smem:[#allocation20_spill]]  ;;  %s1373_s16 = sand.u32 1, %s2055_s21  }
0x18d5   : > { %p2883_p0 = scmp.ne.s32.totalorder %s2867_s12, 0  ;;  %s1374_s28 = scalar_lea.sflag [#allocation4], %s1373_s16 }
0x18da   : > { %p2884_p4 = scmp.ge.s32.totalorder %s2882_s19, 2 }
0x18dc   : > { %p1696_p12 = pnand %p2884_p4, %p2883_p0 }
0x18de   : > { %2042 = dma.done.wait (!%p1696_p12), %s1374_s28, 256  }
0x18df   : > { %2044 = vsyncadd (!%p1696_p12), %s1374_s28, 4294967040  ;;  %s2885_s1 = sadd.s32 4294967294, %s2882_s19  }
0x18e0   : > { %s1382_s9 = sand.u32 1, %s2885_s1  }
0x18e1   : > { %s1383_s13 = scalar_lea.sflag [#allocation10], %s1382_s9 }
0x18e2   : > { %2046 = dma.done.wait (!%p1696_p12), %s1383_s13, 384  }
0x18e3   : > { %2048 = vsyncadd (!%p1696_p12), %s1383_s13, 4294966912  ;;  %s1401_s10 = scalar_lea.sflag [#allocation13], %s1373_s16 }
0x18e4   : > { %2050 = dma.done.wait (!%p1696_p12), %s1401_s10, 128  }
0x18e5   : > { %2052 = vsyncadd (!%p1696_p12), %s1401_s10, 4294967168  ;;  %s32_s26 = sadd.s32 1, %s2882_s19   ;;  %s2886_s15 = sld [smem:[#allocation19_spill]] }
0x18e6   : > { %p29_p10 = scmp.ge.s32.totalorder %s32_s26, 4   ;;  %s2887_s23 = sld [smem:[#allocation22_spill]] }
0x18e7   : > { %s2888_s12 = sld [smem:[#allocation21_spill]]  ;;  %s2889_s21 = smov %s2059_s22 }
0x18e8   : > { %s2891_s24 = smov %s2071_s25  ;;  %31 = sbr.rel (!%p29_p10) target bundleno = 15 (0xf), region = 150 }
0x18eb   : > { %s2890_s22 = smov %s2886_s15 }
0x18ed   : > { %s2892_s25 = smov %s2888_s12 }
0x18ef   :  { %1406 = vsyncpa [#allocation3], 1 }
0x18f0   :  { %1408 = vsyncpa [#allocation3 + $0x1], 1 }
0x18f1   :  { %1409 = vsyncpa [#allocation6], 1 }
0x18f2   :  { %1411 = vsyncpa [#allocation6 + $0x1], 1 }
0x18f3   :  { %1412 = vsyncpa [#allocation4], 1 }
0x18f4   :  { %1414 = vsyncpa [#allocation4 + $0x1], 1 }
0x18f5   :  { %1415 = vsyncpa [#allocation10], 1 }
0x18f6   :  { %1417 = vsyncpa [#allocation10 + $0x1], 1 }
0x18f7   :  { %1418 = vsyncpa [#allocation13], 1 }
0x18f8   :  { %1420 = vsyncpa [#allocation13 + $0x1], 1 }

</bundles_post_ra>
